<compile_context>
chip_gen: v7x
topology: tpu7x:2x2x1
jax: 0.10.0
libtpu: 0.0.40
codegen_flags: <defaults>
</compile_context>

<pallas_src>
import jax
import jax.numpy as jnp
from jax.experimental import pallas as pl
from jax.experimental.pallas import tpu as pltpu

INPUT_DIM = 784
HIDDEN_DIM = 400
LATENT_DIM = 20

# Lane-padded (multiple of 128) feature dims.
IN_PAD = 896          # 784 -> 896
HID_PAD = 512         # 400 -> 512
LAT_PAD = 128         # 20  -> 128
MU_LV_PAD = 2 * LAT_PAD   # fused [mu | logvar] projection width (256)

MAX_TILE_B = 512      # max batch tile (multiple of 8); amortizes weight DMA


def _round_up(n, m):
    return ((n + m - 1) // m) * m


def _vae_kernel(x_ref, eps_ref,
                w1_ref, b1_ref,
                wml_ref, bml_ref,
                w2_ref, b2_ref,
                w3_ref, b3_ref,
                recon_ref, mu_ref, logvar_ref):
    # ----- encode -----
    # x is already bf16 (wrapper cast); MXU matmul with f32 accumulate.
    h = jnp.dot(x_ref[...], w1_ref[...],
                preferred_element_type=jnp.float32)               # [tb, HID_PAD]
    h = jnp.maximum(h + b1_ref[...], 0.0)                         # relu(fc1), f32

    # fused mu / logvar projection: one [HID_PAD, 2*LAT_PAD] matmul
    ml = jnp.dot(h.astype(jnp.bfloat16), wml_ref[...],
                 preferred_element_type=jnp.float32) + bml_ref[...]   # [tb, 256]
    mu = ml[:, :LAT_PAD]                                          # lanes 0..127
    logvar = ml[:, LAT_PAD:]                                      # lanes 128..255

    # ----- reparametrize -----
    # std = exp(0.5 * logvar); eps ~ U[0,1) (torch.rand_like semantics).
    # Padded lanes: mu = logvar = eps = 0  ->  z = 0 exactly.
    z = mu + eps_ref[...].astype(jnp.float32) * jnp.exp(0.5 * logvar)   # [tb, LAT_PAD] f32

    # ----- decode -----
    h2 = jnp.dot(z.astype(jnp.bfloat16), w2_ref[...],
                 preferred_element_type=jnp.float32)              # [tb, HID_PAD]
    h2 = jnp.maximum(h2 + b2_ref[...], 0.0)                       # relu(fc2), f32

    logits = jnp.dot(h2.astype(jnp.bfloat16), w3_ref[...],
                     preferred_element_type=jnp.float32) + b3_ref[...]   # [tb, IN_PAD]
    recon_ref[...] = jax.nn.sigmoid(logits).astype(jnp.bfloat16)  # bf16 store (half traffic)
    mu_ref[...] = mu
    logvar_ref[...] = logvar


def _pad_cast(a, rows, cols, dtype):
    """Cast then zero-pad a 2-D array to [rows, cols] (single fused XLA pass)."""
    a = a.astype(dtype)
    return jnp.pad(a, ((0, rows - a.shape[0]), (0, cols - a.shape[1])))


@jax.jit
def vae_forward(x_nchw, eps, params):
    """Full VAE forward pass in one Pallas kernel.

    x_nchw: [B, 1, 28, 28] float32 (NCHW, as in the PyTorch module)
    eps:    [B, LATENT_DIM] float32, uniform [0,1) noise (torch.rand_like)
    params: dict of weights/biases (weights stored as [in, out], f32).
    Returns (recon [B, 784] bf16, mu [B, 20] f32, logvar [B, 20] f32).
    """
    B = x_nchw.shape[0]
    x = x_nchw.reshape(B, INPUT_DIM)                    # x.view(-1, 784)

    # --- batch tiling (v7x-aware: >= 2 grid steps whenever B > 8 so the
    #     "parallel" batch axis shards across both TensorCores; tiles stay
    #     large for single-TC v5e/v6e) ---
    half = (B + 1) // 2
    tile_b = min(MAX_TILE_B, _round_up(max(half, 8), 8))
    b_pad = _round_up(B, tile_b)
    grid = (b_pad // tile_b,)

    # --- bf16 activations; cast + pad fused into one XLA pass each ---
    x_p = _pad_cast(x, b_pad, IN_PAD, jnp.bfloat16)
    eps_p = _pad_cast(eps, b_pad, LAT_PAD, jnp.bfloat16)

    # --- padded bf16 weights, f32 biases ---
    w1_p = _pad_cast(params["w1"], IN_PAD, HID_PAD, jnp.bfloat16)
    b1_p = _pad_cast(params["b1"], 1, HID_PAD, jnp.float32)

    # fused [mu | logvar] projection: mu -> cols [0, LAT_PAD), logvar -> [LAT_PAD, 2*LAT_PAD)
    wml_p = jnp.concatenate(
        [_pad_cast(params["w_mu"], HID_PAD, LAT_PAD, jnp.bfloat16),
         _pad_cast(params["w_logvar"], HID_PAD, LAT_PAD, jnp.bfloat16)], axis=1)
    bml_p = jnp.concatenate(
        [_pad_cast(params["b_mu"], 1, LAT_PAD, jnp.float32),
         _pad_cast(params["b_logvar"], 1, LAT_PAD, jnp.float32)], axis=1)

    w2_p = _pad_cast(params["w2"], LAT_PAD, HID_PAD, jnp.bfloat16)
    b2_p = _pad_cast(params["b2"], 1, HID_PAD, jnp.float32)
    w3_p = _pad_cast(params["w3"], HID_PAD, IN_PAD, jnp.bfloat16)
    b3_p = _pad_cast(params["b3"], 1, IN_PAD, jnp.float32)

    out_shapes = (
        jax.ShapeDtypeStruct((b_pad, IN_PAD), jnp.bfloat16),   # recon (padded, bf16)
        jax.ShapeDtypeStruct((b_pad, LAT_PAD), jnp.float32),   # mu    (padded)
        jax.ShapeDtypeStruct((b_pad, LAT_PAD), jnp.float32),   # logvar (padded)
    )

    # batch-tiled activations; weights/biases resident (constant index_map)
    def _batch_map(i):
        return (i, 0)

    def _resident(i):
        return (0, 0)

    in_specs = [
        pl.BlockSpec((tile_b, IN_PAD), _batch_map),        # x (bf16)
        pl.BlockSpec((tile_b, LAT_PAD), _batch_map),       # eps (bf16)
        pl.BlockSpec((IN_PAD, HID_PAD), _resident),        # w1
        pl.BlockSpec((1, HID_PAD), _resident),             # b1
        pl.BlockSpec((HID_PAD, MU_LV_PAD), _resident),     # w_mu|logvar fused
        pl.BlockSpec((1, MU_LV_PAD), _resident),           # b_mu|logvar fused
        pl.BlockSpec((LAT_PAD, HID_PAD), _resident),       # w2
        pl.BlockSpec((1, HID_PAD), _resident),             # b2
        pl.BlockSpec((HID_PAD, IN_PAD), _resident),        # w3
        pl.BlockSpec((1, IN_PAD), _resident),              # b3
    ]
    out_specs = [
        pl.BlockSpec((tile_b, IN_PAD), _batch_map),        # recon
        pl.BlockSpec((tile_b, LAT_PAD), _batch_map),       # mu
        pl.BlockSpec((tile_b, LAT_PAD), _batch_map),       # logvar
    ]

    # Advisory cost estimate (helps XLA schedule surrounding ops).
    matmul_flops = 2 * b_pad * (IN_PAD * HID_PAD + HID_PAD * MU_LV_PAD
                                + LAT_PAD * HID_PAD + HID_PAD * IN_PAD)
    weight_bytes = 2 * (IN_PAD * HID_PAD + HID_PAD * MU_LV_PAD
                        + LAT_PAD * HID_PAD + HID_PAD * IN_PAD) \
        + 4 * (HID_PAD + MU_LV_PAD + HID_PAD + IN_PAD)
    act_bytes = b_pad * (2 * IN_PAD + 2 * LAT_PAD          # x, eps in (bf16)
                         + 2 * IN_PAD + 2 * 4 * LAT_PAD)   # recon (bf16), mu/logvar (f32)
    cost = pl.CostEstimate(
        flops=matmul_flops,
        transcendentals=b_pad * (LAT_PAD + IN_PAD),        # exp(0.5*logvar) + sigmoid
        bytes_accessed=weight_bytes + act_bytes)

    kernel = pl.pallas_call(
        _vae_kernel,
        out_shape=out_shapes,
        grid=grid,
        in_specs=in_specs,
        out_specs=out_specs,
        compiler_params=pltpu.CompilerParams(
            dimension_semantics=("parallel",),
            vmem_limit_bytes=48 << 20,
        ),
        cost_estimate=cost,
    )

    recon_p, mu_p, logvar_p = kernel(
        x_p, eps_p,
        w1_p, b1_p,
        wml_p, bml_p,
        w2_p, b2_p,
        w3_p, b3_p,
    )

    # slice padded lanes / padded batch rows back off
    recon = recon_p[:B, :INPUT_DIM]
    mu = mu_p[:B, :LATENT_DIM]
    logvar = logvar_p[:B, :LATENT_DIM]
    return recon, mu, logvar


def init_params(key):
    """Deterministic init mirroring nn.Linear default: U(-1/sqrt(fan_in), +1/sqrt(fan_in)).

    Weights stored as [in_features, out_features] so the kernel computes x @ W + b.
    """
    def linear(k, fan_in, fan_out):
        kw, kb = jax.random.split(k)
        bound = 1.0 / jnp.sqrt(fan_in)
        w = jax.random.uniform(kw, (fan_in, fan_out), jnp.float32, -bound, bound)
        b = jax.random.uniform(kb, (1, fan_out), jnp.float32, -bound, bound)
        return w, b

    ks = jax.random.split(key, 5)
    w1, b1 = linear(ks[0], INPUT_DIM, HIDDEN_DIM)
    w_mu, b_mu = linear(ks[1], HIDDEN_DIM, LATENT_DIM)
    w_lv, b_lv = linear(ks[2], HIDDEN_DIM, LATENT_DIM)
    w2, b2 = linear(ks[3], LATENT_DIM, HIDDEN_DIM)
    w3, b3 = linear(ks[4], HIDDEN_DIM, INPUT_DIM)
    return {
        "w1": w1, "b1": b1,
        "w_mu": w_mu, "b_mu": b_mu,
        "w_logvar": w_lv, "b_logvar": b_lv,
        "w2": w2, "b2": b2,
        "w3": w3, "b3": b3,
    }


def _reference_forward(x_nchw, eps, params):
    """Pure-JAX reference mirroring the kernel numerics (bf16 matmul operands,
    f32 accumulate, bf16 eps and bf16 recon)."""
    def bdot(a, w):
        return jnp.dot(a.astype(jnp.bfloat16), w.astype(jnp.bfloat16),
                       preferred_element_type=jnp.float32)

    B = x_nchw.shape[0]
    x = x_nchw.reshape(B, INPUT_DIM)
    h = jax.nn.relu(bdot(x, params["w1"]) + params["b1"])
    mu = bdot(h, params["w_mu"]) + params["b_mu"]
    logvar = bdot(h, params["w_logvar"]) + params["b_logvar"]
    eps_b = eps.astype(jnp.bfloat16).astype(jnp.float32)
    z = mu + eps_b * jnp.exp(0.5 * logvar)
    h2 = jax.nn.relu(bdot(z, params["w2"]) + params["b2"])
    recon = jax.nn.sigmoid(bdot(h2, params["w3"]) + params["b3"]).astype(jnp.bfloat16)
    return recon, mu, logvar


if __name__ == "__main__":
    key = jax.random.PRNGKey(0)
    k_param, k_x, k_eps = jax.random.split(key, 3)

    B = 8
    params = init_params(k_param)
    x = jax.random.uniform(k_x, (B, 1, 28, 28), jnp.float32)          # MNIST-like NCHW input
    eps = jax.random.uniform(k_eps, (B, LATENT_DIM), jnp.float32)     # torch.rand_like -> U[0,1)

    recon, mu, logvar = vae_forward(x, eps, params)
    jax.block_until_ready((recon, mu, logvar))

    # sanity check vs. pure-JAX reference with matching (bf16) numerics
    r_ref, mu_ref, lv_ref = _reference_forward(x, eps, params)
    assert recon.shape == (B, INPUT_DIM) and recon.dtype == jnp.bfloat16
    assert mu.shape == (B, LATENT_DIM) and logvar.shape == (B, LATENT_DIM)
    assert jnp.allclose(recon.astype(jnp.float32), r_ref.astype(jnp.float32),
                        atol=1e-2, rtol=1e-2), "recon mismatch"
    assert jnp.allclose(mu, mu_ref, atol=2e-3, rtol=2e-3), "mu mismatch"
    assert jnp.allclose(logvar, lv_ref, atol=2e-3, rtol=2e-3), "logvar mismatch"

    print("KERNEL_OK")
</pallas_src>

<mosaic_0001>
module attributes {stable_mosaic.version = 11 : i64} {
  func.func @_vae_kernel(%arg0: i32, %arg1: memref<8x896xbf16, #tpu.memory_space<vmem>>, %arg2: memref<8x128xbf16, #tpu.memory_space<vmem>>, %arg3: memref<896x512xbf16, #tpu.memory_space<vmem>>, %arg4: memref<1x512xf32, #tpu.memory_space<vmem>>, %arg5: memref<512x256xbf16, #tpu.memory_space<vmem>>, %arg6: memref<1x256xf32, #tpu.memory_space<vmem>>, %arg7: memref<128x512xbf16, #tpu.memory_space<vmem>>, %arg8: memref<1x512xf32, #tpu.memory_space<vmem>>, %arg9: memref<512x896xbf16, #tpu.memory_space<vmem>>, %arg10: memref<1x896xf32, #tpu.memory_space<vmem>>, %arg11: memref<8x896xbf16, #tpu.memory_space<vmem>>, %arg12: memref<8x128xf32, #tpu.memory_space<vmem>>, %arg13: memref<8x128xf32, #tpu.memory_space<vmem>>) attributes {dimension_semantics = [#tpu.dimension_semantics<parallel>], iteration_bounds = array<i64: 1>, scalar_prefetch = 0 : i64, scratch_operands = 0 : i64, tpu.core_type = #tpu.core_type<tc>, window_params = [{transform_indices = @transform_0, window_bounds = array<i64: 8, 896>}, {transform_indices = @transform_1, window_bounds = array<i64: 8, 128>}, {pipeline_mode = #tpu.pipeline_mode<synchronous>, transform_indices = @transform_2, window_bounds = array<i64: 896, 512>}, {pipeline_mode = #tpu.pipeline_mode<synchronous>, transform_indices = @transform_3, window_bounds = array<i64: 1, 512>}, {pipeline_mode = #tpu.pipeline_mode<synchronous>, transform_indices = @transform_4, window_bounds = array<i64: 512, 256>}, {pipeline_mode = #tpu.pipeline_mode<synchronous>, transform_indices = @transform_5, window_bounds = array<i64: 1, 256>}, {pipeline_mode = #tpu.pipeline_mode<synchronous>, transform_indices = @transform_6, window_bounds = array<i64: 128, 512>}, {pipeline_mode = #tpu.pipeline_mode<synchronous>, transform_indices = @transform_7, window_bounds = array<i64: 1, 512>}, {pipeline_mode = #tpu.pipeline_mode<synchronous>, transform_indices = @transform_8, window_bounds = array<i64: 512, 896>}, {pipeline_mode = #tpu.pipeline_mode<synchronous>, transform_indices = @transform_9, window_bounds = array<i64: 1, 896>}, {transform_indices = @transform_10, window_bounds = array<i64: 8, 896>}, {transform_indices = @transform_11, window_bounds = array<i64: 8, 128>}, {transform_indices = @transform_12, window_bounds = array<i64: 8, 128>}]} {
    %c0 = arith.constant 0 : index
    %c0_0 = arith.constant 0 : index
    %0 = vector.load %arg1[%c0, %c0_0] : memref<8x896xbf16, #tpu.memory_space<vmem>>, vector<8x896xbf16>
    %c0_1 = arith.constant 0 : index
    %c0_2 = arith.constant 0 : index
    %1 = vector.load %arg3[%c0_1, %c0_2] : memref<896x512xbf16, #tpu.memory_space<vmem>>, vector<896x512xbf16>
    %cst = arith.constant dense<0.000000e+00> : vector<8x512xf32>
    %2 = tpu.matmul %0, %1, %cst {dimension_numbers = #tpu.dot_dimension_numbers<[1], [0], [0], [1], [0, 0, 1, 1], [], []>} : vector<8x896xbf16>, vector<896x512xbf16>, vector<8x512xf32> -> vector<8x512xf32>
    %c0_3 = arith.constant 0 : index
    %c0_4 = arith.constant 0 : index
    %3 = vector.load %arg4[%c0_3, %c0_4] : memref<1x512xf32, #tpu.memory_space<vmem>>, vector<1x512xf32>
    %4 = vector.broadcast %3 : vector<1x512xf32> to vector<8x512xf32>
    %5 = arith.addf %2, %4 : vector<8x512xf32>
    %cst_5 = arith.constant 0.000000e+00 : f32
    %6 = vector.broadcast %cst_5 : f32 to vector<8x512xf32>
    %7 = arith.maximumf %5, %6 : vector<8x512xf32>
    %8 = arith.truncf %7 : vector<8x512xf32> to vector<8x512xbf16>
    %c0_6 = arith.constant 0 : index
    %c0_7 = arith.constant 0 : index
    %9 = vector.load %arg5[%c0_6, %c0_7] : memref<512x256xbf16, #tpu.memory_space<vmem>>, vector<512x256xbf16>
    %cst_8 = arith.constant dense<0.000000e+00> : vector<8x256xf32>
    %10 = tpu.matmul %8, %9, %cst_8 {dimension_numbers = #tpu.dot_dimension_numbers<[1], [0], [0], [1], [0, 0, 1, 1], [], []>} : vector<8x512xbf16>, vector<512x256xbf16>, vector<8x256xf32> -> vector<8x256xf32>
    %c0_9 = arith.constant 0 : index
    %c0_10 = arith.constant 0 : index
    %11 = vector.load %arg6[%c0_9, %c0_10] : memref<1x256xf32, #tpu.memory_space<vmem>>, vector<1x256xf32>
    %12 = vector.broadcast %11 : vector<1x256xf32> to vector<8x256xf32>
    %13 = arith.addf %10, %12 : vector<8x256xf32>
    %14 = vector.extract_strided_slice %13 {offsets = [0, 0], sizes = [8, 128], strides = [1, 1]} : vector<8x256xf32> to vector<8x128xf32>
    %15 = vector.extract_strided_slice %13 {offsets = [0, 128], sizes = [8, 128], strides = [1, 1]} : vector<8x256xf32> to vector<8x128xf32>
    %c0_11 = arith.constant 0 : index
    %c0_12 = arith.constant 0 : index
    %16 = vector.load %arg2[%c0_11, %c0_12] : memref<8x128xbf16, #tpu.memory_space<vmem>>, vector<8x128xbf16>
    %17 = arith.extf %16 : vector<8x128xbf16> to vector<8x128xf32>
    %cst_13 = arith.constant 5.000000e-01 : f32
    %18 = vector.broadcast %cst_13 : f32 to vector<8x128xf32>
    %19 = arith.mulf %18, %15 : vector<8x128xf32>
    %20 = math.exp %19 : vector<8x128xf32>
    %21 = arith.mulf %17, %20 : vector<8x128xf32>
    %22 = arith.addf %14, %21 : vector<8x128xf32>
    %23 = arith.truncf %22 : vector<8x128xf32> to vector<8x128xbf16>
    %c0_14 = arith.constant 0 : index
    %c0_15 = arith.constant 0 : index
    %24 = vector.load %arg7[%c0_14, %c0_15] : memref<128x512xbf16, #tpu.memory_space<vmem>>, vector<128x512xbf16>
    %cst_16 = arith.constant dense<0.000000e+00> : vector<8x512xf32>
    %25 = tpu.matmul %23, %24, %cst_16 {dimension_numbers = #tpu.dot_dimension_numbers<[1], [0], [0], [1], [0, 0, 1, 1], [], []>} : vector<8x128xbf16>, vector<128x512xbf16>, vector<8x512xf32> -> vector<8x512xf32>
    %c0_17 = arith.constant 0 : index
    %c0_18 = arith.constant 0 : index
    %26 = vector.load %arg8[%c0_17, %c0_18] : memref<1x512xf32, #tpu.memory_space<vmem>>, vector<1x512xf32>
    %27 = vector.broadcast %26 : vector<1x512xf32> to vector<8x512xf32>
    %28 = arith.addf %25, %27 : vector<8x512xf32>
    %cst_19 = arith.constant 0.000000e+00 : f32
    %29 = vector.broadcast %cst_19 : f32 to vector<8x512xf32>
    %30 = arith.maximumf %28, %29 : vector<8x512xf32>
    %31 = arith.truncf %30 : vector<8x512xf32> to vector<8x512xbf16>
    %c0_20 = arith.constant 0 : index
    %c0_21 = arith.constant 0 : index
    %32 = vector.load %arg9[%c0_20, %c0_21] : memref<512x896xbf16, #tpu.memory_space<vmem>>, vector<512x896xbf16>
    %cst_22 = arith.constant dense<0.000000e+00> : vector<8x896xf32>
    %33 = tpu.matmul %31, %32, %cst_22 {dimension_numbers = #tpu.dot_dimension_numbers<[1], [0], [0], [1], [0, 0, 1, 1], [], []>} : vector<8x512xbf16>, vector<512x896xbf16>, vector<8x896xf32> -> vector<8x896xf32>
    %c0_23 = arith.constant 0 : index
    %c0_24 = arith.constant 0 : index
    %34 = vector.load %arg10[%c0_23, %c0_24] : memref<1x896xf32, #tpu.memory_space<vmem>>, vector<1x896xf32>
    %35 = vector.broadcast %34 : vector<1x896xf32> to vector<8x896xf32>
    %36 = arith.addf %33, %35 : vector<8x896xf32>
    %37 = arith.negf %36 : vector<8x896xf32>
    %38 = math.exp %37 : vector<8x896xf32>
    %cst_25 = arith.constant 1.000000e+00 : f32
    %39 = vector.broadcast %cst_25 : f32 to vector<8x896xf32>
    %40 = arith.addf %39, %38 : vector<8x896xf32>
    %41 = arith.divf %39, %40 : vector<8x896xf32>
    %42 = arith.truncf %41 : vector<8x896xf32> to vector<8x896xbf16>
    %c0_26 = arith.constant 0 : index
    %c0_27 = arith.constant 0 : index
    %43 = vector.load %arg11[%c0_26, %c0_27] : memref<8x896xbf16, #tpu.memory_space<vmem>>, vector<8x896xbf16>
    tpu.vector_store %arg11[%c0_26, %c0_27], %42 {strides = array<i32>} : memref<8x896xbf16, #tpu.memory_space<vmem>>, vector<8x896xbf16>,
    %c0_28 = arith.constant 0 : index
    %c0_29 = arith.constant 0 : index
    %44 = vector.load %arg12[%c0_28, %c0_29] : memref<8x128xf32, #tpu.memory_space<vmem>>, vector<8x128xf32>
    tpu.vector_store %arg12[%c0_28, %c0_29], %14 {strides = array<i32>} : memref<8x128xf32, #tpu.memory_space<vmem>>, vector<8x128xf32>,
    %c0_30 = arith.constant 0 : index
    %c0_31 = arith.constant 0 : index
    %45 = vector.load %arg13[%c0_30, %c0_31] : memref<8x128xf32, #tpu.memory_space<vmem>>, vector<8x128xf32>
    tpu.vector_store %arg13[%c0_30, %c0_31], %15 {strides = array<i32>} : memref<8x128xf32, #tpu.memory_space<vmem>>, vector<8x128xf32>,
    return
  }
  func.func @transform_0(%arg0: i32) -> (i32, i32) {
    %c0_i32 = arith.constant 0 : i32
    %c0_i32_0 = arith.constant 0 : i32
    return %arg0, %c0_i32 : i32, i32
  }
  func.func @transform_1(%arg0: i32) -> (i32, i32) {
    %c0_i32 = arith.constant 0 : i32
    %c0_i32_0 = arith.constant 0 : i32
    return %arg0, %c0_i32 : i32, i32
  }
  func.func @transform_2(%arg0: i32) -> (i32, i32) {
    %c0_i32 = arith.constant 0 : i32
    %c0_i32_0 = arith.constant 0 : i32
    %c0_i32_1 = arith.constant 0 : i32
    return %c0_i32, %c0_i32_0 : i32, i32
  }
  func.func @transform_3(%arg0: i32) -> (i32, i32) {
    %c0_i32 = arith.constant 0 : i32
    %c0_i32_0 = arith.constant 0 : i32
    %c0_i32_1 = arith.constant 0 : i32
    return %c0_i32, %c0_i32_0 : i32, i32
  }
  func.func @transform_4(%arg0: i32) -> (i32, i32) {
    %c0_i32 = arith.constant 0 : i32
    %c0_i32_0 = arith.constant 0 : i32
    %c0_i32_1 = arith.constant 0 : i32
    return %c0_i32, %c0_i32_0 : i32, i32
  }
  func.func @transform_5(%arg0: i32) -> (i32, i32) {
    %c0_i32 = arith.constant 0 : i32
    %c0_i32_0 = arith.constant 0 : i32
    %c0_i32_1 = arith.constant 0 : i32
    return %c0_i32, %c0_i32_0 : i32, i32
  }
  func.func @transform_6(%arg0: i32) -> (i32, i32) {
    %c0_i32 = arith.constant 0 : i32
    %c0_i32_0 = arith.constant 0 : i32
    %c0_i32_1 = arith.constant 0 : i32
    return %c0_i32, %c0_i32_0 : i32, i32
  }
  func.func @transform_7(%arg0: i32) -> (i32, i32) {
    %c0_i32 = arith.constant 0 : i32
    %c0_i32_0 = arith.constant 0 : i32
    %c0_i32_1 = arith.constant 0 : i32
    return %c0_i32, %c0_i32_0 : i32, i32
  }
  func.func @transform_8(%arg0: i32) -> (i32, i32) {
    %c0_i32 = arith.constant 0 : i32
    %c0_i32_0 = arith.constant 0 : i32
    %c0_i32_1 = arith.constant 0 : i32
    return %c0_i32, %c0_i32_0 : i32, i32
  }
  func.func @transform_9(%arg0: i32) -> (i32, i32) {
    %c0_i32 = arith.constant 0 : i32
    %c0_i32_0 = arith.constant 0 : i32
    %c0_i32_1 = arith.constant 0 : i32
    return %c0_i32, %c0_i32_0 : i32, i32
  }
  func.func @transform_10(%arg0: i32) -> (i32, i32) {
    %c0_i32 = arith.constant 0 : i32
    %c0_i32_0 = arith.constant 0 : i32
    return %arg0, %c0_i32 : i32, i32
  }
  func.func @transform_11(%arg0: i32) -> (i32, i32) {
    %c0_i32 = arith.constant 0 : i32
    %c0_i32_0 = arith.constant 0 : i32
    return %arg0, %c0_i32 : i32, i32
  }
  func.func @transform_12(%arg0: i32) -> (i32, i32) {
    %c0_i32 = arith.constant 0 : i32
    %c0_i32_0 = arith.constant 0 : i32
    return %arg0, %c0_i32 : i32, i32
  }
}

</mosaic_0001>

<bundles_post_ra>
// kernel: vae_forward.1
= control target key start
LH: loop header
LB: loop body
LE: loop exit
PB: predicated region body
PF: predicated region fallthrough
CT: control target
= control target key end

     0   :  { %18 = vsyncpa [#allocation3], 0  ;;  %s7886_s0 = inlined_call_operand.vmem [shape: bf16[8,896], index: 0, kind: input, shape index: {}]   ;;  %s7887_s1 = inlined_call_operand.vmem [shape: bf16[8,128], index: 1, kind: input, shape index: {}]   ;;  %s7888_s2 = inlined_call_operand.vmem [shape: bf16[896,512], index: 2, kind: input, shape index: {}]   ;;  %s7889_s3 = inlined_call_operand.vmem [shape: f32[1,512], index: 3, kind: input, shape index: {}]   ;;  %s7890_s4 = inlined_call_operand.vmem [shape: bf16[512,256], index: 4, kind: input, shape index: {}]   ;;  %s7891_s5 = inlined_call_operand.vmem [shape: f32[1,256], index: 5, kind: input, shape index: {}]   ;;  %s7892_s6 = inlined_call_operand.vmem [shape: bf16[128,512], index: 6, kind: input, shape index: {}]   ;;  %s7893_s7 = inlined_call_operand.vmem [shape: f32[1,512], index: 7, kind: input, shape index: {}]   ;;  %s7894_s8 = inlined_call_operand.vmem [shape: bf16[512,896], index: 8, kind: input, shape index: {}]   ;;  %s7895_s9 = inlined_call_operand.vmem [shape: f32[1,896], index: 9, kind: input, shape index: {}]   ;;  %s7896_s10 = inlined_call_operand.hbm [shape: bf16[8,896], index: 10, kind: output, shape index: {0}]   ;;  %s7897_s11 = inlined_call_operand.hbm [shape: f32[8,128], index: 11, kind: output, shape index: {1}]   ;;  %s7898_s12 = inlined_call_operand.hbm [shape: f32[8,128], index: 12, kind: output, shape index: {2}]  }
   0x1   :  { %v5117_v0 = vld [vmem:[%s7888_s2 + $0x4] ss:$16 sps:$4 sm:$0xff]   ;;  %v5119_v1 = vld [vmem:[%s7888_s2 + $0xc] ss:$16 sps:$4 sm:$0xff]   ;;  %v5121_v2 = vld [vmem:[%s7888_s2] ss:$16 sps:$4 sm:$0xff]  }
   0x2   :  { %1436 = vmatprep.subr.bf16.mxu0 %v5117_v0  ;;  %v5122_v3 = vld [vmem:[%s7888_s2 + $0x8] ss:$16 sps:$4 sm:$0xff]   ;;  %1600 = vmatprep.subr.bf16.mxu1 %v5119_v1  ;;  %v5123_v4 = vld [vmem:[%s7888_s2 + $0x24] ss:$16 sps:$4 sm:$0xff]   ;;  %v5125_v5 = vld [vmem:[%s7888_s2 + $0x2c] ss:$16 sps:$4 sm:$0xff]  }
   0x3   :  { %1437 = vmatpush1.bf16.msra.mxu0 %v5121_v2  ;;  %1601 = vmatpush1.bf16.msra.mxu1 %v5122_v3  ;;  %v5127_v6 = vld [vmem:[%s7888_s2 + $0x20] ss:$16 sps:$4 sm:$0xff]   ;;  %v5128_v7 = vld [vmem:[%s7888_s2 + $0x28] ss:$16 sps:$4 sm:$0xff]   ;;  %v5129_v8 = vld [vmem:[%s7888_s2 + $0x44] ss:$16 sps:$4 sm:$0xff]  }
   0x4   :  { %1438 = vmatprep.subr.bf16.mxu0 %v5123_v4  ;;  %1602 = vmatprep.subr.bf16.mxu1 %v5125_v5  ;;  %v5131_v9 = vld [vmem:[%s7888_s2 + $0x4c] ss:$16 sps:$4 sm:$0xff]   ;;  %v5133_v10 = vld [vmem:[%s7888_s2 + $0x40] ss:$16 sps:$4 sm:$0xff]   ;;  %v5134_v11 = vld [vmem:[%s7888_s2 + $0x48] ss:$16 sps:$4 sm:$0xff]  }
   0x5   :  { %v5135_v12 = vld [vmem:[%s7888_s2 + $0x64] ss:$16 sps:$4 sm:$0xff]   ;;  %v5137_v13 = vld [vmem:[%s7888_s2 + $0x6c] ss:$16 sps:$4 sm:$0xff]   ;;  %v5139_v14 = vld [vmem:[%s7888_s2 + $0x60] ss:$16 sps:$4 sm:$0xff]  }
   0x6   :  { %v5140_v15 = vld [vmem:[%s7888_s2 + $0x68] ss:$16 sps:$4 sm:$0xff]   ;;  %v5141_v16 = vld [vmem:[%s7888_s2 + $0x84] ss:$16 sps:$4 sm:$0xff]   ;;  %v5143_v17 = vld [vmem:[%s7888_s2 + $0x8c] ss:$16 sps:$4 sm:$0xff]  }
   0x7   :  { %1439 = vmatpush1.bf16.msra.mxu0 %v5127_v6  ;;  %1603 = vmatpush1.bf16.msra.mxu1 %v5128_v7  ;;  %v5145_v18 = vld [vmem:[%s7888_s2 + $0x80] ss:$16 sps:$4 sm:$0xff]   ;;  %v5146_v19 = vld [vmem:[%s7888_s2 + $0x88] ss:$16 sps:$4 sm:$0xff]   ;;  %v5147_v20 = vld [vmem:[%s7888_s2 + $0xa4] ss:$16 sps:$4 sm:$0xff]  }
   0x8   :  { %1440 = vmatprep.subr.bf16.mxu0 %v5129_v8  ;;  %1604 = vmatprep.subr.bf16.mxu1 %v5131_v9  ;;  %v5149_v21 = vld [vmem:[%s7888_s2 + $0xac] ss:$16 sps:$4 sm:$0xff]   ;;  %v5151_v22 = vld [vmem:[%s7888_s2 + $0xa0] ss:$16 sps:$4 sm:$0xff]   ;;  %v5152_v23 = vld [vmem:[%s7888_s2 + $0xa8] ss:$16 sps:$4 sm:$0xff]  }
   0x9   :  { %v5153_v24 = vld [vmem:[%s7888_s2 + $0xc4] ss:$16 sps:$4 sm:$0xff]   ;;  %v5155_v25 = vld [vmem:[%s7888_s2 + $0xcc] ss:$16 sps:$4 sm:$0xff]   ;;  %v5157_v26 = vld [vmem:[%s7888_s2 + $0xc0] ss:$16 sps:$4 sm:$0xff]  }
   0xa   :  { %v5158_v27 = vld [vmem:[%s7888_s2 + $0xc8] ss:$16 sps:$4 sm:$0xff]   ;;  %v5159_v28 = vld [vmem:[%s7888_s2 + $0xe4] ss:$16 sps:$4 sm:$0xff]   ;;  %v5161_v29 = vld [vmem:[%s7888_s2 + $0xec] ss:$16 sps:$4 sm:$0xff]  }
   0xb   :  { %1441 = vmatpush1.bf16.msra.mxu0 %v5133_v10  ;;  %1605 = vmatpush1.bf16.msra.mxu1 %v5134_v11  ;;  %v5163_v30 = vld [vmem:[%s7888_s2 + $0xe0] ss:$16 sps:$4 sm:$0xff]   ;;  %v5164_v31 = vld [vmem:[%s7888_s2 + $0xe8] ss:$16 sps:$4 sm:$0xff]   ;;  %v5165_v32 = vld [vmem:[%s7888_s2 + $0x104] ss:$16 sps:$4 sm:$0xff]  }
   0xc   :  { %1442 = vmatprep.subr.bf16.mxu0 %v5135_v12  ;;  %1606 = vmatprep.subr.bf16.mxu1 %v5137_v13  ;;  %v5167_v33 = vld [vmem:[%s7888_s2 + $0x10c] ss:$16 sps:$4 sm:$0xff]   ;;  %v5169_v34 = vld [vmem:[%s7888_s2 + $0x100] ss:$16 sps:$4 sm:$0xff]   ;;  %v5170_v35 = vld [vmem:[%s7888_s2 + $0x108] ss:$16 sps:$4 sm:$0xff]  }
   0xd   :  { %v5171_v36 = vld [vmem:[%s7888_s2 + $0x124] ss:$16 sps:$4 sm:$0xff]   ;;  %v5173_v37 = vld [vmem:[%s7888_s2 + $0x12c] ss:$16 sps:$4 sm:$0xff]   ;;  %v5175_v38 = vld [vmem:[%s7888_s2 + $0x120] ss:$16 sps:$4 sm:$0xff]  }
   0xe   :  { %v5176_v39 = vld [vmem:[%s7888_s2 + $0x128] ss:$16 sps:$4 sm:$0xff]   ;;  %v5177_v40 = vld [vmem:[%s7888_s2 + $0x144] ss:$16 sps:$4 sm:$0xff]   ;;  %v5179_v41 = vld [vmem:[%s7888_s2 + $0x14c] ss:$16 sps:$4 sm:$0xff]  }
   0xf   :  { %1443 = vmatpush1.bf16.msra.mxu0 %v5139_v14  ;;  %1607 = vmatpush1.bf16.msra.mxu1 %v5140_v15  ;;  %v5181_v42 = vld [vmem:[%s7888_s2 + $0x140] ss:$16 sps:$4 sm:$0xff]   ;;  %v5182_v43 = vld [vmem:[%s7888_s2 + $0x148] ss:$16 sps:$4 sm:$0xff]   ;;  %v5183_v44 = vld [vmem:[%s7888_s2 + $0x164] ss:$16 sps:$4 sm:$0xff]  }
  0x10   :  { %1444 = vmatprep.subr.bf16.mxu0 %v5141_v16  ;;  %1608 = vmatprep.subr.bf16.mxu1 %v5143_v17  ;;  %v5185_v45 = vld [vmem:[%s7888_s2 + $0x16c] ss:$16 sps:$4 sm:$0xff]   ;;  %v41_v46 = vld [vmem:[%s7886_s0] sm:$0xff]  ;;  %v5188_v49 = vld [vmem:[%s7888_s2 + $0x168] ss:$16 sps:$4 sm:$0xff]  }
  0x11   :  { %v5187_v47 = vld [vmem:[%s7888_s2 + $0x160] ss:$16 sps:$4 sm:$0xff]   ;;  %v4452_v48 = vcombine.high %v41_v46, %v41_v46  ;;  %v5189_v50 = vld [vmem:[%s7888_s2 + $0x184] ss:$16 sps:$4 sm:$0xff]   ;;  %v5191_v51 = vld [vmem:[%s7888_s2 + $0x18c] ss:$16 sps:$4 sm:$0xff]   ;;  %v4451_v4 = vcombine.low %v41_v46, %v41_v46 }
  0x12   :  { %v5193_v52 = vld [vmem:[%s7888_s2 + $0x180] ss:$16 sps:$4 sm:$0xff]   ;;  %v5194_v53 = vld [vmem:[%s7888_s2 + $0x188] ss:$16 sps:$4 sm:$0xff]   ;;  %v5195_v54 = vld [vmem:[%s7888_s2 + $0x1a4] ss:$16 sps:$4 sm:$0xff]  }
  0x13   :  { %1445 = vmatpush1.bf16.msra.mxu0 %v5145_v18  ;;  %1609 = vmatpush1.bf16.msra.mxu1 %v5146_v19  ;;  %v5197_v55 = vld [vmem:[%s7888_s2 + $0x1ac] ss:$16 sps:$4 sm:$0xff]   ;;  %v5199_v56 = vld [vmem:[%s7888_s2 + $0x1a0] ss:$16 sps:$4 sm:$0xff]   ;;  %v5200_v57 = vld [vmem:[%s7888_s2 + $0x1a8] ss:$16 sps:$4 sm:$0xff]  }
  0x14   :  { %1446 = vmatprep.subr.bf16.mxu0 %v5147_v20  ;;  %1610 = vmatprep.subr.bf16.mxu1 %v5149_v21  ;;  %v5201_v58 = vld [vmem:[%s7888_s2 + $0x1c4] ss:$16 sps:$4 sm:$0xff]   ;;  %v5203_v59 = vld [vmem:[%s7888_s2 + $0x1cc] ss:$16 sps:$4 sm:$0xff]   ;;  %v5205_v60 = vld [vmem:[%s7888_s2 + $0x1c0] ss:$16 sps:$4 sm:$0xff]  }
  0x15   :  { %1468 = vmatprep.mubr.bf16.mxu0 %v4452_v48  ;;  %1632 = vmatprep.mubr.bf16.mxu1 %v4452_v48  ;;  %v5206_v61 = vld [vmem:[%s7888_s2 + $0x1c8] ss:$16 sps:$4 sm:$0xff]   ;;  %v5207_v62 = vld [vmem:[%s7888_s2 + $0x1e4] ss:$16 sps:$4 sm:$0xff]   ;;  %v5209_v63 = vld [vmem:[%s7888_s2 + $0x1ec] ss:$16 sps:$4 sm:$0xff]  }
  0x16   :  { %v5211_v0 = vld [vmem:[%s7888_s2 + $0x1e0] ss:$16 sps:$4 sm:$0xff]   ;;  %v5212_v1 = vld [vmem:[%s7888_s2 + $0x1e8] ss:$16 sps:$4 sm:$0xff]   ;;  %v5217_v2 = vld [vmem:[%s7888_s2 + $0x204] ss:$16 sps:$4 sm:$0xff]  }
  0x17   :  { %1447 = vmatpush1.bf16.msra.mxu0 %v5151_v22  ;;  %1611 = vmatpush1.bf16.msra.mxu1 %v5152_v23  ;;  %v5220_v3 = vld [vmem:[%s7888_s2 + $0x20c] ss:$16 sps:$4 sm:$0xff]   ;;  %v5215_v5 = vld [vmem:[%s7888_s2 + $0x200] ss:$16 sps:$4 sm:$0xff]   ;;  %v5218_v6 = vld [vmem:[%s7888_s2 + $0x208] ss:$16 sps:$4 sm:$0xff]  }
  0x18   :  { %1448 = vmatprep.subr.bf16.mxu0 %v5153_v24  ;;  %1612 = vmatprep.subr.bf16.mxu1 %v5155_v25  ;;  %v5223_v7 = vld [vmem:[%s7888_s2 + $0x224] ss:$16 sps:$4 sm:$0xff]   ;;  %v5226_v8 = vld [vmem:[%s7888_s2 + $0x22c] ss:$16 sps:$4 sm:$0xff]   ;;  %v5221_v9 = vld [vmem:[%s7888_s2 + $0x220] ss:$16 sps:$4 sm:$0xff]  }
  0x19   :  { %v5224_v10 = vld [vmem:[%s7888_s2 + $0x228] ss:$16 sps:$4 sm:$0xff]   ;;  %v5229_v11 = vld [vmem:[%s7888_s2 + $0x244] ss:$16 sps:$4 sm:$0xff]   ;;  %v5232_v12 = vld [vmem:[%s7888_s2 + $0x24c] ss:$16 sps:$4 sm:$0xff]  }
  0x1a   :  { %v5227_v13 = vld [vmem:[%s7888_s2 + $0x240] ss:$16 sps:$4 sm:$0xff]   ;;  %v5230_v14 = vld [vmem:[%s7888_s2 + $0x248] ss:$16 sps:$4 sm:$0xff]   ;;  %v5235_v15 = vld [vmem:[%s7888_s2 + $0x264] ss:$16 sps:$4 sm:$0xff]  }
  0x1b   :  { %1449 = vmatpush1.bf16.msra.mxu0 %v5157_v26  ;;  %1613 = vmatpush1.bf16.msra.mxu1 %v5158_v27  ;;  %v5238_v16 = vld [vmem:[%s7888_s2 + $0x26c] ss:$16 sps:$4 sm:$0xff]   ;;  %v5233_v17 = vld [vmem:[%s7888_s2 + $0x260] ss:$16 sps:$4 sm:$0xff]   ;;  %v5236_v18 = vld [vmem:[%s7888_s2 + $0x268] ss:$16 sps:$4 sm:$0xff]  }
  0x1c   :  { %1450 = vmatprep.subr.bf16.mxu0 %v5159_v28  ;;  %1614 = vmatprep.subr.bf16.mxu1 %v5161_v29  ;;  %v5241_v19 = vld [vmem:[%s7888_s2 + $0x284] ss:$16 sps:$4 sm:$0xff]   ;;  %v5244_v20 = vld [vmem:[%s7888_s2 + $0x28c] ss:$16 sps:$4 sm:$0xff]   ;;  %v5239_v21 = vld [vmem:[%s7888_s2 + $0x280] ss:$16 sps:$4 sm:$0xff]  }
  0x1d   :  { %v5242_v22 = vld [vmem:[%s7888_s2 + $0x288] ss:$16 sps:$4 sm:$0xff]   ;;  %v5247_v23 = vld [vmem:[%s7888_s2 + $0x2a4] ss:$16 sps:$4 sm:$0xff]   ;;  %v5250_v24 = vld [vmem:[%s7888_s2 + $0x2ac] ss:$16 sps:$4 sm:$0xff]  }
  0x1e   :  { %v5245_v25 = vld [vmem:[%s7888_s2 + $0x2a0] ss:$16 sps:$4 sm:$0xff]   ;;  %v5248_v26 = vld [vmem:[%s7888_s2 + $0x2a8] ss:$16 sps:$4 sm:$0xff]   ;;  %v5253_v27 = vld [vmem:[%s7888_s2 + $0x2c4] ss:$16 sps:$4 sm:$0xff]  }
  0x1f   :  { %1451 = vmatpush1.bf16.msra.mxu0 %v5163_v30  ;;  %1615 = vmatpush1.bf16.msra.mxu1 %v5164_v31  ;;  %v5256_v28 = vld [vmem:[%s7888_s2 + $0x2cc] ss:$16 sps:$4 sm:$0xff]   ;;  %v5251_v31 = vld [vmem:[%s7888_s2 + $0x2c0] ss:$16 sps:$4 sm:$0xff]   ;;  %v5278_v48 = vld [vmem:[%s7888_s2 + $0x348] ss:$16 sps:$4 sm:$0xff]  }
  0x20   :  { %1452 = vmatprep.subr.bf16.mxu0 %v5165_v32  ;;  %1616 = vmatprep.subr.bf16.mxu1 %v5167_v33  ;;  %v6369_v29 = vld [vmem:[%s7886_s0 + $0x8] sm:$0xff]  ;;  %v5259_v33 = vld [vmem:[%s7888_s2 + $0x2e4] ss:$16 sps:$4 sm:$0xff]  }
  0x21   :  { %v4454_v30 = vcombine.high %v6369_v29, %v6369_v29  ;;  %v5254_v32 = vld [vmem:[%s7888_s2 + $0x2c8] ss:$16 sps:$4 sm:$0xff]   ;;  %v5280_v46 = vld [vmem:[%s7888_s2 + $0x34c] ss:$16 sps:$4 sm:$0xff]  }
  0x23   :  { %1453 = vmatpush1.bf16.msra.mxu0 %v5169_v34  ;;  %1617 = vmatpush1.bf16.msra.mxu1 %v5170_v35  ;;  %v5262_v34 = vld [vmem:[%s7888_s2 + $0x2ec] ss:$16 sps:$4 sm:$0xff]   ;;  %v5257_v35 = vld [vmem:[%s7888_s2 + $0x2e0] ss:$16 sps:$4 sm:$0xff]  }
  0x24   :  { %1454 = vmatprep.subr.bf16.mxu0 %v5171_v36  ;;  %1618 = vmatprep.subr.bf16.mxu1 %v5173_v37  ;;  %v5260_v36 = vld [vmem:[%s7888_s2 + $0x2e8] ss:$16 sps:$4 sm:$0xff]   ;;  %v5265_v37 = vld [vmem:[%s7888_s2 + $0x304] ss:$16 sps:$4 sm:$0xff]  }
  0x27   :  { %1455 = vmatpush1.bf16.msra.mxu0 %v5175_v38  ;;  %1619 = vmatpush1.bf16.msra.mxu1 %v5176_v39  ;;  %v5268_v38 = vld [vmem:[%s7888_s2 + $0x30c] ss:$16 sps:$4 sm:$0xff]   ;;  %v5263_v39 = vld [vmem:[%s7888_s2 + $0x300] ss:$16 sps:$4 sm:$0xff]  }
  0x28   :  { %1456 = vmatprep.subr.bf16.mxu0 %v5177_v40  ;;  %1620 = vmatprep.subr.bf16.mxu1 %v5179_v41  ;;  %v5266_v40 = vld [vmem:[%s7888_s2 + $0x308] ss:$16 sps:$4 sm:$0xff]   ;;  %v5271_v41 = vld [vmem:[%s7888_s2 + $0x324] ss:$16 sps:$4 sm:$0xff]  }
  0x2b   :  { %1457 = vmatpush1.bf16.msra.mxu0 %v5181_v42  ;;  %1621 = vmatpush1.bf16.msra.mxu1 %v5182_v43  ;;  %v5274_v42 = vld [vmem:[%s7888_s2 + $0x32c] ss:$16 sps:$4 sm:$0xff]   ;;  %v5269_v43 = vld [vmem:[%s7888_s2 + $0x320] ss:$16 sps:$4 sm:$0xff]  }
  0x2c   :  { %1458 = vmatprep.subr.bf16.mxu0 %v5183_v44  ;;  %1622 = vmatprep.subr.bf16.mxu1 %v5185_v45  ;;  %v5272_v44 = vld [vmem:[%s7888_s2 + $0x328] ss:$16 sps:$4 sm:$0xff]   ;;  %v5277_v45 = vld [vmem:[%s7888_s2 + $0x344] ss:$16 sps:$4 sm:$0xff]  }
  0x2f   :  { %1459 = vmatpush1.bf16.msra.mxu0 %v5187_v47  ;;  %1623 = vmatpush1.bf16.msra.mxu1 %v5188_v49  ;;  %v5275_v47 = vld [vmem:[%s7888_s2 + $0x340] ss:$16 sps:$4 sm:$0xff]   ;;  %v5283_v49 = vld [vmem:[%s7888_s2 + $0x364] ss:$16 sps:$4 sm:$0xff]  }
  0x30   :  { %1460 = vmatprep.subr.bf16.mxu0 %v5189_v50  ;;  %1624 = vmatprep.subr.bf16.mxu1 %v5191_v51  ;;  %v5286_v50 = vld [vmem:[%s7888_s2 + $0x36c] ss:$16 sps:$4 sm:$0xff]   ;;  %v5281_v51 = vld [vmem:[%s7888_s2 + $0x360] ss:$16 sps:$4 sm:$0xff]  }
  0x33   :  { %1461 = vmatpush1.bf16.msra.mxu0 %v5193_v52  ;;  %1625 = vmatpush1.bf16.msra.mxu1 %v5194_v53  ;;  %v5284_v52 = vld [vmem:[%s7888_s2 + $0x368] ss:$16 sps:$4 sm:$0xff]   ;;  %v5289_v53 = vld [vmem:[%s7888_s2 + $0x384] ss:$16 sps:$4 sm:$0xff]  }
  0x34   :  { %1462 = vmatprep.subr.bf16.mxu0 %v5195_v54  ;;  %1626 = vmatprep.subr.bf16.mxu1 %v5197_v55  ;;  %v5292_v54 = vld [vmem:[%s7888_s2 + $0x38c] ss:$16 sps:$4 sm:$0xff]   ;;  %v5287_v55 = vld [vmem:[%s7888_s2 + $0x380] ss:$16 sps:$4 sm:$0xff]  }
  0x37   :  { %1463 = vmatpush1.bf16.msra.mxu0 %v5199_v56  ;;  %1627 = vmatpush1.bf16.msra.mxu1 %v5200_v57  ;;  %v5290_v56 = vld [vmem:[%s7888_s2 + $0x388] ss:$16 sps:$4 sm:$0xff]   ;;  %v5295_v57 = vld [vmem:[%s7888_s2 + $0x3a4] ss:$16 sps:$4 sm:$0xff]  }
  0x38   :  { %1464 = vmatprep.subr.bf16.mxu0 %v5201_v58  ;;  %1628 = vmatprep.subr.bf16.mxu1 %v5203_v59  ;;  %v5298_v58 = vld [vmem:[%s7888_s2 + $0x3ac] ss:$16 sps:$4 sm:$0xff]   ;;  %v5293_v59 = vld [vmem:[%s7888_s2 + $0x3a0] ss:$16 sps:$4 sm:$0xff]  }
  0x3b   :  { %1465 = vmatpush1.bf16.msra.mxu0 %v5205_v60  ;;  %1629 = vmatpush1.bf16.msra.mxu1 %v5206_v61  ;;  %v5296_v60 = vld [vmem:[%s7888_s2 + $0x3a8] ss:$16 sps:$4 sm:$0xff]   ;;  %v5301_v61 = vld [vmem:[%s7888_s2 + $0x3c4] ss:$16 sps:$4 sm:$0xff]  }
  0x3c   :  { %1466 = vmatprep.subr.bf16.mxu0 %v5207_v62  ;;  %1630 = vmatprep.subr.bf16.mxu1 %v5209_v63  ;;  %v5304_v62 = vld [vmem:[%s7888_s2 + $0x3cc] ss:$16 sps:$4 sm:$0xff]   ;;  %v5299_v63 = vld [vmem:[%s7888_s2 + $0x3c0] ss:$16 sps:$4 sm:$0xff]  }
  0x3f   :  { %1467 = vmatpush1.bf16.msra.mxu0 %v5211_v0  ;;  %1631 = vmatpush1.bf16.msra.mxu1 %v5212_v1  ;;  %v5302_v0 = vld [vmem:[%s7888_s2 + $0x3c8] ss:$16 sps:$4 sm:$0xff]   ;;  %v5307_v1 = vld [vmem:[%s7888_s2 + $0x3e4] ss:$16 sps:$4 sm:$0xff]  }
  0x40   :  { %1477 = vmatprep.subr.bf16.mxu0 %v5217_v2  ;;  %1641 = vmatprep.subr.bf16.mxu1 %v5220_v3  ;;  %v5310_v2 = vld [vmem:[%s7888_s2 + $0x3ec] ss:$16 sps:$4 sm:$0xff]   ;;  %v5305_v3 = vld [vmem:[%s7888_s2 + $0x3e0] ss:$16 sps:$4 sm:$0xff]  }
  0x42   :  { %1469 = vmatmul.mubr.bf16.vlgmr.msra.gmra.mrb[0].mxu0 %v4451_v4  ;;  %1633 = vmatmul.mubr.bf16.vlgmr.msra.gmra.mrb[0].mxu1 %v4451_v4  ;;  %v5308_v4 = vld [vmem:[%s7888_s2 + $0x3e8] ss:$16 sps:$4 sm:$0xff]  }
  0x43   :  { %1478 = vmatpush1.bf16.msra.mxu0 %v5215_v5  ;;  %1642 = vmatpush1.bf16.msra.mxu1 %v5218_v6  ;;  %v5315_v5 = vld [vmem:[%s7888_s2 + $0x404] ss:$16 sps:$4 sm:$0xff]   ;;  %v5318_v6 = vld [vmem:[%s7888_s2 + $0x40c] ss:$16 sps:$4 sm:$0xff]  }
  0x44   :  { %1479 = vmatprep.subr.bf16.mxu0 %v5223_v7  ;;  %1643 = vmatprep.subr.bf16.mxu1 %v5226_v8  ;;  %v4453_v7 = vcombine.low %v6369_v29, %v6369_v29  ;;  %v5313_v8 = vld [vmem:[%s7888_s2 + $0x400] ss:$16 sps:$4 sm:$0xff]   ;;  %v5348_v29 = vld [vmem:[%s7888_s2 + $0x4ac] ss:$16 sps:$4 sm:$0xff]  }
  0x45   :  { %1509 = vmatprep.mubr.bf16.mxu0 %v4454_v30  ;;  %1673 = vmatprep.mubr.bf16.mxu1 %v4454_v30  ;;  %v5343_v30 = vld [vmem:[%s7888_s2 + $0x4a0] ss:$16 sps:$4 sm:$0xff]  }
  0x47   :  { %1480 = vmatpush1.bf16.msra.mxu0 %v5221_v9  ;;  %1644 = vmatpush1.bf16.msra.mxu1 %v5224_v10  ;;  %v5316_v9 = vld [vmem:[%s7888_s2 + $0x408] ss:$16 sps:$4 sm:$0xff]   ;;  %v5321_v10 = vld [vmem:[%s7888_s2 + $0x424] ss:$16 sps:$4 sm:$0xff]  }
  0x48   :  { %1481 = vmatprep.subr.bf16.mxu0 %v5229_v11  ;;  %1645 = vmatprep.subr.bf16.mxu1 %v5232_v12  ;;  %v6507_v11 = vld [vmem:[%s7886_s0 + $0x10] sm:$0xff]  ;;  %v5324_v12 = vld [vmem:[%s7888_s2 + $0x42c] ss:$16 sps:$4 sm:$0xff]  }
  0x4b   :  { %1482 = vmatpush1.bf16.msra.mxu0 %v5227_v13  ;;  %1646 = vmatpush1.bf16.msra.mxu1 %v5230_v14  ;;  %v4456_v13 = vcombine.high %v6507_v11, %v6507_v11  ;;  %v5319_v14 = vld [vmem:[%s7888_s2 + $0x420] ss:$16 sps:$4 sm:$0xff]  }
  0x4c   :  { %1483 = vmatprep.subr.bf16.mxu0 %v5235_v15  ;;  %1647 = vmatprep.subr.bf16.mxu1 %v5238_v16  ;;  %v5322_v15 = vld [vmem:[%s7888_s2 + $0x428] ss:$16 sps:$4 sm:$0xff]   ;;  %v5327_v16 = vld [vmem:[%s7888_s2 + $0x444] ss:$16 sps:$4 sm:$0xff]  }
  0x4f   :  { %1484 = vmatpush1.bf16.msra.mxu0 %v5233_v17  ;;  %1648 = vmatpush1.bf16.msra.mxu1 %v5236_v18  ;;  %v5330_v17 = vld [vmem:[%s7888_s2 + $0x44c] ss:$16 sps:$4 sm:$0xff]   ;;  %v5325_v18 = vld [vmem:[%s7888_s2 + $0x440] ss:$16 sps:$4 sm:$0xff]  }
  0x50   :  { %1485 = vmatprep.subr.bf16.mxu0 %v5241_v19  ;;  %1649 = vmatprep.subr.bf16.mxu1 %v5244_v20  ;;  %v5328_v19 = vld [vmem:[%s7888_s2 + $0x448] ss:$16 sps:$4 sm:$0xff]   ;;  %v5333_v20 = vld [vmem:[%s7888_s2 + $0x464] ss:$16 sps:$4 sm:$0xff]  }
  0x53   :  { %1486 = vmatpush1.bf16.msra.mxu0 %v5239_v21  ;;  %1650 = vmatpush1.bf16.msra.mxu1 %v5242_v22  ;;  %v5336_v21 = vld [vmem:[%s7888_s2 + $0x46c] ss:$16 sps:$4 sm:$0xff]   ;;  %v5331_v22 = vld [vmem:[%s7888_s2 + $0x460] ss:$16 sps:$4 sm:$0xff]  }
  0x54   :  { %1487 = vmatprep.subr.bf16.mxu0 %v5247_v23  ;;  %1651 = vmatprep.subr.bf16.mxu1 %v5250_v24  ;;  %v5334_v23 = vld [vmem:[%s7888_s2 + $0x468] ss:$16 sps:$4 sm:$0xff]   ;;  %v5339_v24 = vld [vmem:[%s7888_s2 + $0x484] ss:$16 sps:$4 sm:$0xff]  }
  0x57   :  { %1488 = vmatpush1.bf16.msra.mxu0 %v5245_v25  ;;  %1652 = vmatpush1.bf16.msra.mxu1 %v5248_v26  ;;  %v5342_v25 = vld [vmem:[%s7888_s2 + $0x48c] ss:$16 sps:$4 sm:$0xff]   ;;  %v5337_v26 = vld [vmem:[%s7888_s2 + $0x480] ss:$16 sps:$4 sm:$0xff]  }
  0x58   :  { %1489 = vmatprep.subr.bf16.mxu0 %v5253_v27  ;;  %1653 = vmatprep.subr.bf16.mxu1 %v5256_v28  ;;  %v5340_v27 = vld [vmem:[%s7888_s2 + $0x488] ss:$16 sps:$4 sm:$0xff]   ;;  %v5345_v28 = vld [vmem:[%s7888_s2 + $0x4a4] ss:$16 sps:$4 sm:$0xff]  }
  0x5b   :  { %1490 = vmatpush1.bf16.msra.mxu0 %v5251_v31  ;;  %1654 = vmatpush1.bf16.msra.mxu1 %v5254_v32  ;;  %v5346_v31 = vld [vmem:[%s7888_s2 + $0x4a8] ss:$16 sps:$4 sm:$0xff]   ;;  %v5351_v32 = vld [vmem:[%s7888_s2 + $0x4c4] ss:$16 sps:$4 sm:$0xff]  }
  0x5c   :  { %1491 = vmatprep.subr.bf16.mxu0 %v5259_v33  ;;  %1655 = vmatprep.subr.bf16.mxu1 %v5262_v34  ;;  %v5354_v33 = vld [vmem:[%s7888_s2 + $0x4cc] ss:$16 sps:$4 sm:$0xff]   ;;  %v5349_v34 = vld [vmem:[%s7888_s2 + $0x4c0] ss:$16 sps:$4 sm:$0xff]  }
  0x5f   :  { %1492 = vmatpush1.bf16.msra.mxu0 %v5257_v35  ;;  %1656 = vmatpush1.bf16.msra.mxu1 %v5260_v36  ;;  %v5352_v35 = vld [vmem:[%s7888_s2 + $0x4c8] ss:$16 sps:$4 sm:$0xff]   ;;  %v5357_v36 = vld [vmem:[%s7888_s2 + $0x4e4] ss:$16 sps:$4 sm:$0xff]  }
  0x60   :  { %1493 = vmatprep.subr.bf16.mxu0 %v5265_v37  ;;  %1657 = vmatprep.subr.bf16.mxu1 %v5268_v38  ;;  %v5360_v37 = vld [vmem:[%s7888_s2 + $0x4ec] ss:$16 sps:$4 sm:$0xff]   ;;  %v5355_v38 = vld [vmem:[%s7888_s2 + $0x4e0] ss:$16 sps:$4 sm:$0xff]  }
  0x63   :  { %1494 = vmatpush1.bf16.msra.mxu0 %v5263_v39  ;;  %1658 = vmatpush1.bf16.msra.mxu1 %v5266_v40  ;;  %v5358_v39 = vld [vmem:[%s7888_s2 + $0x4e8] ss:$16 sps:$4 sm:$0xff]   ;;  %v5363_v40 = vld [vmem:[%s7888_s2 + $0x504] ss:$16 sps:$4 sm:$0xff]  }
  0x64   :  { %1495 = vmatprep.subr.bf16.mxu0 %v5271_v41  ;;  %1659 = vmatprep.subr.bf16.mxu1 %v5274_v42  ;;  %v5366_v41 = vld [vmem:[%s7888_s2 + $0x50c] ss:$16 sps:$4 sm:$0xff]   ;;  %v5361_v42 = vld [vmem:[%s7888_s2 + $0x500] ss:$16 sps:$4 sm:$0xff]  }
  0x67   :  { %1496 = vmatpush1.bf16.msra.mxu0 %v5269_v43  ;;  %1660 = vmatpush1.bf16.msra.mxu1 %v5272_v44  ;;  %v5364_v43 = vld [vmem:[%s7888_s2 + $0x508] ss:$16 sps:$4 sm:$0xff]   ;;  %v5369_v44 = vld [vmem:[%s7888_s2 + $0x524] ss:$16 sps:$4 sm:$0xff]  }
  0x68   :  { %1497 = vmatprep.subr.bf16.mxu0 %v5277_v45  ;;  %1661 = vmatprep.subr.bf16.mxu1 %v5280_v46  ;;  %v5372_v45 = vld [vmem:[%s7888_s2 + $0x52c] ss:$16 sps:$4 sm:$0xff]   ;;  %v5367_v46 = vld [vmem:[%s7888_s2 + $0x520] ss:$16 sps:$4 sm:$0xff]  }
  0x6b   :  { %1498 = vmatpush1.bf16.msra.mxu0 %v5275_v47  ;;  %1662 = vmatpush1.bf16.msra.mxu1 %v5278_v48  ;;  %v5370_v47 = vld [vmem:[%s7888_s2 + $0x528] ss:$16 sps:$4 sm:$0xff]   ;;  %v5375_v48 = vld [vmem:[%s7888_s2 + $0x544] ss:$16 sps:$4 sm:$0xff]  }
  0x6c   :  { %1499 = vmatprep.subr.bf16.mxu0 %v5283_v49  ;;  %1663 = vmatprep.subr.bf16.mxu1 %v5286_v50  ;;  %v5378_v49 = vld [vmem:[%s7888_s2 + $0x54c] ss:$16 sps:$4 sm:$0xff]   ;;  %v5373_v50 = vld [vmem:[%s7888_s2 + $0x540] ss:$16 sps:$4 sm:$0xff]  }
  0x6f   :  { %1500 = vmatpush1.bf16.msra.mxu0 %v5281_v51  ;;  %1664 = vmatpush1.bf16.msra.mxu1 %v5284_v52  ;;  %v5376_v51 = vld [vmem:[%s7888_s2 + $0x548] ss:$16 sps:$4 sm:$0xff]   ;;  %v5381_v52 = vld [vmem:[%s7888_s2 + $0x564] ss:$16 sps:$4 sm:$0xff]  }
  0x70   :  { %1501 = vmatprep.subr.bf16.mxu0 %v5289_v53  ;;  %1665 = vmatprep.subr.bf16.mxu1 %v5292_v54  ;;  %v5384_v53 = vld [vmem:[%s7888_s2 + $0x56c] ss:$16 sps:$4 sm:$0xff]   ;;  %v5379_v54 = vld [vmem:[%s7888_s2 + $0x560] ss:$16 sps:$4 sm:$0xff]  }
  0x73   :  { %1502 = vmatpush1.bf16.msra.mxu0 %v5287_v55  ;;  %1666 = vmatpush1.bf16.msra.mxu1 %v5290_v56  ;;  %v5382_v55 = vld [vmem:[%s7888_s2 + $0x568] ss:$16 sps:$4 sm:$0xff]   ;;  %v5387_v56 = vld [vmem:[%s7888_s2 + $0x584] ss:$16 sps:$4 sm:$0xff]  }
  0x74   :  { %1503 = vmatprep.subr.bf16.mxu0 %v5295_v57  ;;  %1667 = vmatprep.subr.bf16.mxu1 %v5298_v58  ;;  %v5390_v57 = vld [vmem:[%s7888_s2 + $0x58c] ss:$16 sps:$4 sm:$0xff]   ;;  %v5385_v58 = vld [vmem:[%s7888_s2 + $0x580] ss:$16 sps:$4 sm:$0xff]  }
  0x77   :  { %1504 = vmatpush1.bf16.msra.mxu0 %v5293_v59  ;;  %1668 = vmatpush1.bf16.msra.mxu1 %v5296_v60  ;;  %v5388_v59 = vld [vmem:[%s7888_s2 + $0x588] ss:$16 sps:$4 sm:$0xff]   ;;  %v5393_v60 = vld [vmem:[%s7888_s2 + $0x5a4] ss:$16 sps:$4 sm:$0xff]  }
  0x78   :  { %1505 = vmatprep.subr.bf16.mxu0 %v5301_v61  ;;  %1669 = vmatprep.subr.bf16.mxu1 %v5304_v62  ;;  %v5396_v61 = vld [vmem:[%s7888_s2 + $0x5ac] ss:$16 sps:$4 sm:$0xff]   ;;  %v5391_v62 = vld [vmem:[%s7888_s2 + $0x5a0] ss:$16 sps:$4 sm:$0xff]  }
  0x7b   :  { %1506 = vmatpush1.bf16.msra.mxu0 %v5299_v63  ;;  %1670 = vmatpush1.bf16.msra.mxu1 %v5302_v0  ;;  %v5394_v63 = vld [vmem:[%s7888_s2 + $0x5a8] ss:$16 sps:$4 sm:$0xff]   ;;  %v5399_v0 = vld [vmem:[%s7888_s2 + $0x5c4] ss:$16 sps:$4 sm:$0xff]  }
  0x7c   :  { %1507 = vmatprep.subr.bf16.mxu0 %v5307_v1  ;;  %1671 = vmatprep.subr.bf16.mxu1 %v5310_v2  ;;  %v5402_v1 = vld [vmem:[%s7888_s2 + $0x5cc] ss:$16 sps:$4 sm:$0xff]   ;;  %v5397_v2 = vld [vmem:[%s7888_s2 + $0x5c0] ss:$16 sps:$4 sm:$0xff]  }
  0x7f   :  { %1508 = vmatpush1.bf16.msra.mxu0 %v5305_v3  ;;  %1672 = vmatpush1.bf16.msra.mxu1 %v5308_v4  ;;  %v5400_v3 = vld [vmem:[%s7888_s2 + $0x5c8] ss:$16 sps:$4 sm:$0xff]   ;;  %v5405_v4 = vld [vmem:[%s7888_s2 + $0x5e4] ss:$16 sps:$4 sm:$0xff]  }
  0x80   :  { %1518 = vmatprep.subr.bf16.mxu0 %v5315_v5  ;;  %1682 = vmatprep.subr.bf16.mxu1 %v5318_v6  ;;  %v5408_v5 = vld [vmem:[%s7888_s2 + $0x5ec] ss:$16 sps:$4 sm:$0xff]   ;;  %v5403_v6 = vld [vmem:[%s7888_s2 + $0x5e0] ss:$16 sps:$4 sm:$0xff]  }
  0x82   :  { %1510 = vmatmul.mubr.bf16.vlgmr.msra.gmra.mrb[0].mxu0 %v4453_v7  ;;  %1674 = vmatmul.mubr.bf16.vlgmr.msra.gmra.mrb[0].mxu1 %v4453_v7  ;;  %v5406_v7 = vld [vmem:[%s7888_s2 + $0x5e8] ss:$16 sps:$4 sm:$0xff]  }
  0x83   :  { %1519 = vmatpush1.bf16.msra.mxu0 %v5313_v8  ;;  %1683 = vmatpush1.bf16.msra.mxu1 %v5316_v9  ;;  %v5413_v8 = vld [vmem:[%s7888_s2 + $0x604] ss:$16 sps:$4 sm:$0xff]   ;;  %v5416_v9 = vld [vmem:[%s7888_s2 + $0x60c] ss:$16 sps:$4 sm:$0xff]  }
  0x84   :  { %1520 = vmatprep.subr.bf16.mxu0 %v5321_v10  ;;  %1684 = vmatprep.subr.bf16.mxu1 %v5324_v12  ;;  %v5411_v10 = vld [vmem:[%s7888_s2 + $0x600] ss:$16 sps:$4 sm:$0xff]   ;;  %v5414_v12 = vld [vmem:[%s7888_s2 + $0x608] ss:$16 sps:$4 sm:$0xff]  }
  0x85   :  { %1550 = vmatprep.mubr.bf16.mxu0 %v4456_v13  ;;  %1714 = vmatprep.mubr.bf16.mxu1 %v4456_v13  ;;  %v4455_v13 = vcombine.low %v6507_v11, %v6507_v11  ;;  %v5420_v11 = vld [vmem:[%s7888_s2 + $0x628] ss:$16 sps:$4 sm:$0xff]  }
  0x87   :  { %1521 = vmatpush1.bf16.msra.mxu0 %v5319_v14  ;;  %1685 = vmatpush1.bf16.msra.mxu1 %v5322_v15  ;;  %v5419_v14 = vld [vmem:[%s7888_s2 + $0x624] ss:$16 sps:$4 sm:$0xff]   ;;  %v5422_v15 = vld [vmem:[%s7888_s2 + $0x62c] ss:$16 sps:$4 sm:$0xff]  }
  0x88   :  { %1522 = vmatprep.subr.bf16.mxu0 %v5327_v16  ;;  %1686 = vmatprep.subr.bf16.mxu1 %v5330_v17  ;;  %v5417_v16 = vld [vmem:[%s7888_s2 + $0x620] ss:$16 sps:$4 sm:$0xff]   ;;  %v5425_v17 = vld [vmem:[%s7888_s2 + $0x644] ss:$16 sps:$4 sm:$0xff]  }
  0x8b   :  { %1523 = vmatpush1.bf16.msra.mxu0 %v5325_v18  ;;  %1687 = vmatpush1.bf16.msra.mxu1 %v5328_v19  ;;  %v5428_v18 = vld [vmem:[%s7888_s2 + $0x64c] ss:$16 sps:$4 sm:$0xff]   ;;  %v5423_v19 = vld [vmem:[%s7888_s2 + $0x640] ss:$16 sps:$4 sm:$0xff]  }
  0x8c   :  { %1524 = vmatprep.subr.bf16.mxu0 %v5333_v20  ;;  %1688 = vmatprep.subr.bf16.mxu1 %v5336_v21  ;;  %v5426_v20 = vld [vmem:[%s7888_s2 + $0x648] ss:$16 sps:$4 sm:$0xff]   ;;  %v6024_v21 = vmov 0  }
  0x8f   :  { %1525 = vmatpush1.bf16.msra.mxu0 %v5331_v22  ;;  %1689 = vmatpush1.bf16.msra.mxu1 %v5334_v23  ;;  %v5431_v22 = vld [vmem:[%s7888_s2 + $0x664] ss:$16 sps:$4 sm:$0xff]   ;;  %v5434_v23 = vld [vmem:[%s7888_s2 + $0x66c] ss:$16 sps:$4 sm:$0xff]  }
  0x90   :  { %1526 = vmatprep.subr.bf16.mxu0 %v5339_v24  ;;  %1690 = vmatprep.subr.bf16.mxu1 %v5342_v25  ;;  %v5429_v24 = vld [vmem:[%s7888_s2 + $0x660] ss:$16 sps:$4 sm:$0xff]   ;;  %v5432_v25 = vld [vmem:[%s7888_s2 + $0x668] ss:$16 sps:$4 sm:$0xff]  }
  0x93   :  { %1527 = vmatpush1.bf16.msra.mxu0 %v5337_v26  ;;  %1691 = vmatpush1.bf16.msra.mxu1 %v5340_v27  ;;  %v5437_v26 = vld [vmem:[%s7888_s2 + $0x684] ss:$16 sps:$4 sm:$0xff]   ;;  %v5440_v27 = vld [vmem:[%s7888_s2 + $0x68c] ss:$16 sps:$4 sm:$0xff]  }
  0x94   :  { %1528 = vmatprep.subr.bf16.mxu0 %v5345_v28  ;;  %1692 = vmatprep.subr.bf16.mxu1 %v5348_v29  ;;  %v5435_v28 = vld [vmem:[%s7888_s2 + $0x680] ss:$16 sps:$4 sm:$0xff]   ;;  %v5438_v29 = vld [vmem:[%s7888_s2 + $0x688] ss:$16 sps:$4 sm:$0xff]  }
  0x97   :  { %1529 = vmatpush1.bf16.msra.mxu0 %v5343_v30  ;;  %1693 = vmatpush1.bf16.msra.mxu1 %v5346_v31  ;;  %v5443_v30 = vld [vmem:[%s7888_s2 + $0x6a4] ss:$16 sps:$4 sm:$0xff]   ;;  %v5446_v31 = vld [vmem:[%s7888_s2 + $0x6ac] ss:$16 sps:$4 sm:$0xff]  }
  0x98   :  { %1530 = vmatprep.subr.bf16.mxu0 %v5351_v32  ;;  %1694 = vmatprep.subr.bf16.mxu1 %v5354_v33  ;;  %v5441_v32 = vld [vmem:[%s7888_s2 + $0x6a0] ss:$16 sps:$4 sm:$0xff]   ;;  %v5444_v33 = vld [vmem:[%s7888_s2 + $0x6a8] ss:$16 sps:$4 sm:$0xff]  }
  0x9b   :  { %1531 = vmatpush1.bf16.msra.mxu0 %v5349_v34  ;;  %1695 = vmatpush1.bf16.msra.mxu1 %v5352_v35  ;;  %v5449_v34 = vld [vmem:[%s7888_s2 + $0x6c4] ss:$16 sps:$4 sm:$0xff]   ;;  %v5452_v35 = vld [vmem:[%s7888_s2 + $0x6cc] ss:$16 sps:$4 sm:$0xff]  }
  0x9c   :  { %1532 = vmatprep.subr.bf16.mxu0 %v5357_v36  ;;  %1696 = vmatprep.subr.bf16.mxu1 %v5360_v37  ;;  %v5447_v36 = vld [vmem:[%s7888_s2 + $0x6c0] ss:$16 sps:$4 sm:$0xff]   ;;  %v5450_v37 = vld [vmem:[%s7888_s2 + $0x6c8] ss:$16 sps:$4 sm:$0xff]  }
  0x9f   :  { %1533 = vmatpush1.bf16.msra.mxu0 %v5355_v38  ;;  %1697 = vmatpush1.bf16.msra.mxu1 %v5358_v39  ;;  %v5455_v38 = vld [vmem:[%s7888_s2 + $0x6e4] ss:$16 sps:$4 sm:$0xff]   ;;  %v5458_v39 = vld [vmem:[%s7888_s2 + $0x6ec] ss:$16 sps:$4 sm:$0xff]  }
  0xa0   :  { %1534 = vmatprep.subr.bf16.mxu0 %v5363_v40  ;;  %1698 = vmatprep.subr.bf16.mxu1 %v5366_v41  ;;  %v5453_v40 = vld [vmem:[%s7888_s2 + $0x6e0] ss:$16 sps:$4 sm:$0xff]   ;;  %v5456_v41 = vld [vmem:[%s7888_s2 + $0x6e8] ss:$16 sps:$4 sm:$0xff]  }
  0xa3   :  { %1535 = vmatpush1.bf16.msra.mxu0 %v5361_v42  ;;  %1699 = vmatpush1.bf16.msra.mxu1 %v5364_v43  ;;  %v5462_v42 = vld [vmem:[%s7890_s4 + $0x4] ss:$8 sps:$4 sm:$0xff]   ;;  %v5459_v43 = vld [vmem:[%s7886_s0 + $0x18] ss:$0 sps:$4 sm:$0xff]  }
  0xa4   :  { %1536 = vmatprep.subr.bf16.mxu0 %v5369_v44  ;;  %1700 = vmatprep.subr.bf16.mxu1 %v5372_v45  ;;  %v5460_v44 = vld [vmem:[%s7890_s4] ss:$8 sps:$4 sm:$0xff]   ;;  %v5465_v45 = vld [vmem:[%s7890_s4 + $0x14] ss:$8 sps:$4 sm:$0xff]  }
  0xa7   :  { %1537 = vmatpush1.bf16.msra.mxu0 %v5367_v46  ;;  %1701 = vmatpush1.bf16.msra.mxu1 %v5370_v47  ;;  %v5463_v46 = vld [vmem:[%s7890_s4 + $0x10] ss:$8 sps:$4 sm:$0xff]   ;;  %v5468_v47 = vld [vmem:[%s7890_s4 + $0x24] ss:$8 sps:$4 sm:$0xff]  }
  0xa8   :  { %1538 = vmatprep.subr.bf16.mxu0 %v5375_v48  ;;  %1702 = vmatprep.subr.bf16.mxu1 %v5378_v49  ;;  %v5466_v48 = vld [vmem:[%s7890_s4 + $0x20] ss:$8 sps:$4 sm:$0xff]   ;;  %v5471_v49 = vld [vmem:[%s7890_s4 + $0x34] ss:$8 sps:$4 sm:$0xff]  }
  0xab   :  { %1539 = vmatpush1.bf16.msra.mxu0 %v5373_v50  ;;  %1703 = vmatpush1.bf16.msra.mxu1 %v5376_v51  ;;  %v5469_v50 = vld [vmem:[%s7890_s4 + $0x30] ss:$8 sps:$4 sm:$0xff]   ;;  %v5474_v51 = vld [vmem:[%s7890_s4 + $0x44] ss:$8 sps:$4 sm:$0xff]  }
  0xac   :  { %1540 = vmatprep.subr.bf16.mxu0 %v5381_v52  ;;  %1704 = vmatprep.subr.bf16.mxu1 %v5384_v53  ;;  %v5472_v52 = vld [vmem:[%s7890_s4 + $0x40] ss:$8 sps:$4 sm:$0xff]   ;;  %v5477_v53 = vld [vmem:[%s7890_s4 + $0x54] ss:$8 sps:$4 sm:$0xff]  }
  0xaf   :  { %1541 = vmatpush1.bf16.msra.mxu0 %v5379_v54  ;;  %1705 = vmatpush1.bf16.msra.mxu1 %v5382_v55  ;;  %v5475_v54 = vld [vmem:[%s7890_s4 + $0x50] ss:$8 sps:$4 sm:$0xff]   ;;  %v5480_v55 = vld [vmem:[%s7890_s4 + $0x64] ss:$8 sps:$4 sm:$0xff]  }
  0xb0   :  { %1542 = vmatprep.subr.bf16.mxu0 %v5387_v56  ;;  %1706 = vmatprep.subr.bf16.mxu1 %v5390_v57  ;;  %v5478_v56 = vld [vmem:[%s7890_s4 + $0x60] ss:$8 sps:$4 sm:$0xff]   ;;  %v5483_v57 = vld [vmem:[%s7890_s4 + $0x74] ss:$8 sps:$4 sm:$0xff]  }
  0xb3   :  { %1543 = vmatpush1.bf16.msra.mxu0 %v5385_v58  ;;  %1707 = vmatpush1.bf16.msra.mxu1 %v5388_v59  ;;  %v5481_v58 = vld [vmem:[%s7890_s4 + $0x70] ss:$8 sps:$4 sm:$0xff]   ;;  %v5486_v59 = vld [vmem:[%s7890_s4 + $0x84] ss:$8 sps:$4 sm:$0xff]  }
  0xb4   :  { %1544 = vmatprep.subr.bf16.mxu0 %v5393_v60  ;;  %1708 = vmatprep.subr.bf16.mxu1 %v5396_v61  ;;  %v5484_v60 = vld [vmem:[%s7890_s4 + $0x80] ss:$8 sps:$4 sm:$0xff]   ;;  %v5489_v61 = vld [vmem:[%s7890_s4 + $0x94] ss:$8 sps:$4 sm:$0xff]  }
  0xb7   :  { %1545 = vmatpush1.bf16.msra.mxu0 %v5391_v62  ;;  %1709 = vmatpush1.bf16.msra.mxu1 %v5394_v63  ;;  %v5487_v62 = vld [vmem:[%s7890_s4 + $0x90] ss:$8 sps:$4 sm:$0xff]   ;;  %v5492_v63 = vld [vmem:[%s7890_s4 + $0xa4] ss:$8 sps:$4 sm:$0xff]  }
  0xb8   :  { %1546 = vmatprep.subr.bf16.mxu0 %v5399_v0  ;;  %1710 = vmatprep.subr.bf16.mxu1 %v5402_v1  ;;  %v5490_v0 = vld [vmem:[%s7890_s4 + $0xa0] ss:$8 sps:$4 sm:$0xff]   ;;  %v5495_v1 = vld [vmem:[%s7890_s4 + $0xb4] ss:$8 sps:$4 sm:$0xff]  }
  0xbb   :  { %1547 = vmatpush1.bf16.msra.mxu0 %v5397_v2  ;;  %1711 = vmatpush1.bf16.msra.mxu1 %v5400_v3  ;;  %v5493_v2 = vld [vmem:[%s7890_s4 + $0xb0] ss:$8 sps:$4 sm:$0xff]   ;;  %v5498_v3 = vld [vmem:[%s7890_s4 + $0xc4] ss:$8 sps:$4 sm:$0xff]  }
  0xbc   :  { %1548 = vmatprep.subr.bf16.mxu0 %v5405_v4  ;;  %1712 = vmatprep.subr.bf16.mxu1 %v5408_v5  ;;  %v5496_v4 = vld [vmem:[%s7890_s4 + $0xc0] ss:$8 sps:$4 sm:$0xff]   ;;  %v5501_v5 = vld [vmem:[%s7890_s4 + $0xd4] ss:$8 sps:$4 sm:$0xff]  }
  0xbf   :  { %1549 = vmatpush1.bf16.msra.mxu0 %v5403_v6  ;;  %1713 = vmatpush1.bf16.msra.mxu1 %v5406_v7  ;;  %v5499_v6 = vld [vmem:[%s7890_s4 + $0xd0] ss:$8 sps:$4 sm:$0xff]  }
  0xc0   :  { %1559 = vmatprep.subr.bf16.mxu0 %v5413_v8  ;;  %1723 = vmatprep.subr.bf16.mxu1 %v5416_v9 }
  0xc2   :  { %1551 = vmatmul.mubr.bf16.vlgmr.msra.gmra.mrb[0].mxu0 %v4455_v13  ;;  %1715 = vmatmul.mubr.bf16.vlgmr.msra.gmra.mrb[0].mxu1 %v4455_v13 }
  0xc3   :  { %1560 = vmatpush1.bf16.msra.mxu0 %v5411_v10  ;;  %1724 = vmatpush1.bf16.msra.mxu1 %v5414_v12 }
  0xc4   :  { %1561 = vmatprep.subr.bf16.mxu0 %v5419_v14  ;;  %1725 = vmatprep.subr.bf16.mxu1 %v5422_v15 }
  0xc5   :  { %1591 = vmatprep.mubr.bf16.mxu0 %v6024_v21  ;;  %1755 = vmatprep.mubr.bf16.mxu1 %v6024_v21 }
  0xc7   :  { %1562 = vmatpush1.bf16.msra.mxu0 %v5417_v16  ;;  %1726 = vmatpush1.bf16.msra.mxu1 %v5420_v11 }
  0xc8   :  { %1563 = vmatprep.subr.bf16.mxu0 %v5425_v17  ;;  %1727 = vmatprep.subr.bf16.mxu1 %v5428_v18 }
  0xcb   :  { %1564 = vmatpush1.bf16.msra.mxu0 %v5423_v19  ;;  %1728 = vmatpush1.bf16.msra.mxu1 %v5426_v20 }
  0xcc   :  { %1565 = vmatprep.subr.bf16.mxu0 %v5431_v22  ;;  %1729 = vmatprep.subr.bf16.mxu1 %v5434_v23 }
  0xcf   :  { %1566 = vmatpush1.bf16.msra.mxu0 %v5429_v24  ;;  %1730 = vmatpush1.bf16.msra.mxu1 %v5432_v25 }
  0xd0   :  { %1567 = vmatprep.subr.bf16.mxu0 %v5437_v26  ;;  %1731 = vmatprep.subr.bf16.mxu1 %v5440_v27 }
  0xd3   :  { %1568 = vmatpush1.bf16.msra.mxu0 %v5435_v28  ;;  %1732 = vmatpush1.bf16.msra.mxu1 %v5438_v29 }
  0xd4   :  { %1569 = vmatprep.subr.bf16.mxu0 %v5443_v30  ;;  %1733 = vmatprep.subr.bf16.mxu1 %v5446_v31 }
  0xd7   :  { %1570 = vmatpush1.bf16.msra.mxu0 %v5441_v32  ;;  %1734 = vmatpush1.bf16.msra.mxu1 %v5444_v33 }
  0xd8   :  { %1571 = vmatprep.subr.bf16.mxu0 %v5449_v34  ;;  %1735 = vmatprep.subr.bf16.mxu1 %v5452_v35 }
  0xdb   :  { %1572 = vmatpush1.bf16.msra.mxu0 %v5447_v36  ;;  %1736 = vmatpush1.bf16.msra.mxu1 %v5450_v37 }
  0xdc   :  { %1573 = vmatprep.subr.bf16.mxu0 %v5455_v38  ;;  %1737 = vmatprep.subr.bf16.mxu1 %v5458_v39 }
  0xdf   :  { %1574 = vmatpush1.bf16.msra.mxu0 %v5453_v40  ;;  %1738 = vmatpush1.bf16.msra.mxu1 %v5456_v41 }
  0xe0   :  { %2168 = vmatprep.subr.bf16.mxu0 %v5462_v42 }
  0xe2   :  { %1592 = vmatmul.mubr.bf16.vlgmr.msra.gmra.mrb[0].mxu0 %v5459_v43  ;;  %1756 = vmatmul.mubr.bf16.vlgmr.msra.gmra.mrb[0].mxu1 %v5459_v43 }
  0xe3   :  { %2169 = vmatpush1.bf16.msra.mxu0 %v5460_v44  ;;  %2504 = vmatprep.mubr.bf16.mxu1 %v6024_v21 }
  0xe4   :  { %2170 = vmatprep.subr.bf16.mxu0 %v5465_v45 }
  0xe7   :  { %2171 = vmatpush1.bf16.msra.mxu0 %v5463_v46 }
  0xe8   :  { %2172 = vmatprep.subr.bf16.mxu0 %v5468_v47 }
  0xeb   :  { %2173 = vmatpush1.bf16.msra.mxu0 %v5466_v48 }
  0xec   :  { %2174 = vmatprep.subr.bf16.mxu0 %v5471_v49 }
  0xef   :  { %2175 = vmatpush1.bf16.msra.mxu0 %v5469_v50 }
  0xf0   :  { %2176 = vmatprep.subr.bf16.mxu0 %v5474_v51 }
  0xf3   :  { %2177 = vmatpush1.bf16.msra.mxu0 %v5472_v52 }
  0xf4   :  { %2178 = vmatprep.subr.bf16.mxu0 %v5477_v53 }
  0xf7   :  { %2179 = vmatpush1.bf16.msra.mxu0 %v5475_v54 }
  0xf8   :  { %2180 = vmatprep.subr.bf16.mxu0 %v5480_v55 }
  0xfb   :  { %2181 = vmatpush1.bf16.msra.mxu0 %v5478_v56 }
  0xfc   :  { %2182 = vmatprep.subr.bf16.mxu0 %v5483_v57 }
  0xff   :  { %2183 = vmatpush1.bf16.msra.mxu0 %v5481_v58 }
 0x100   :  { %2184 = vmatprep.subr.bf16.mxu0 %v5486_v59 }
 0x103   :  { %2185 = vmatpush1.bf16.msra.mxu0 %v5484_v60 }
 0x104   :  { %2186 = vmatprep.subr.bf16.mxu0 %v5489_v61 }
 0x107   :  { %2187 = vmatpush1.bf16.msra.mxu0 %v5487_v62 }
 0x108   :  { %2188 = vmatprep.subr.bf16.mxu0 %v5492_v63 }
 0x10b   :  { %2189 = vmatpush1.bf16.msra.mxu0 %v5490_v0 }
 0x10c   :  { %2190 = vmatprep.subr.bf16.mxu0 %v5495_v1 }
 0x10f   :  { %2191 = vmatpush1.bf16.msra.mxu0 %v5493_v2 }
 0x110   :  { %2192 = vmatprep.subr.bf16.mxu0 %v5498_v3 }
 0x113   :  { %2193 = vmatpush1.bf16.msra.mxu0 %v5496_v4 }
 0x114   :  { %2194 = vmatprep.subr.bf16.mxu0 %v5501_v5 }
 0x115   :  { %19 = vsyncpa [#allocation5], 0  ;;  %v5504_v7 = vld [vmem:[%s7890_s4 + $0xe4] ss:$8 sps:$4 sm:$0xff]   ;;  %v5502_v8 = vld [vmem:[%s7890_s4 + $0xe0] ss:$8 sps:$4 sm:$0xff]   ;;  %v271_v11 = vlaneseq }
 0x116   :  { %v5507_v9 = vld [vmem:[%s7890_s4 + $0xf4] ss:$8 sps:$4 sm:$0xff]   ;;  %v5505_v10 = vld [vmem:[%s7890_s4 + $0xf0] ss:$8 sps:$4 sm:$0xff]   ;;  %v5510_v12 = vld [vmem:[%s7890_s4 + $0x104] ss:$8 sps:$4 sm:$0xff]  }
 0x117   :  { %2195 = vmatpush1.bf16.msra.mxu0 %v5499_v6  ;;  %v5556_v13 = vld [vmem:[%s7892_s6] ss:$16 sps:$4 sm:$0xff]   ;;  %v5558_v14 = vld [vmem:[%s7892_s6 + $0x4] ss:$16 sps:$4 sm:$0xff]   ;;  %v6903_v17 = vshrl.u32 %v271_v11, 7 }
 0x118   :  { %2196 = vmatprep.subr.bf16.mxu0 %v5504_v7  ;;  %v5561_v15 = vld [vmem:[%s7892_s6 + $0x24] ss:$16 sps:$4 sm:$0xff]   ;;  %2472 = vmatprep.subr.bf16.mxu1 %v5558_v14  ;;  %v5559_v16 = vld [vmem:[%s7892_s6 + $0x20] ss:$16 sps:$4 sm:$0xff]  }
 0x119   :  { %2473 = vmatpush1.bf16.msra.mxu1 %v5556_v13  ;;  %v6906_v18 = vsub.s32 0, %v6903_v17  ;;  %v6911_v19 = vld [vmem:[%s7889_s3] sm:$0xf]  ;;  %v6914_v20 = vsub.s32 1, %v6903_v17  ;;  %v6917_v22 = vsub.s32 3, %v6903_v17  ;;  %v7003_v4 = vsub.s32 2, %v6903_v17 }
 0x11a   :  { %2474 = vmatprep.subr.bf16.mxu1 %v5561_v15  ;;  %v5508_v41 = vld [vmem:[%s7890_s4 + $0x100] ss:$8 sps:$4 sm:$0xff]   ;;  %v5513_v43 = vld [vmem:[%s7890_s4 + $0x114] ss:$8 sps:$4 sm:$0xff]   ;;  %v5511_v45 = vld [vmem:[%s7890_s4 + $0x110] ss:$8 sps:$4 sm:$0xff]  }
 0x11b   :  { %2197 = vmatpush1.bf16.msra.mxu0 %v5502_v8  ;;  %v274_v23 = vrot.slane %v6911_v19, %v6906_v18  ;;  %v278_v24 = vrot.slane %v6911_v19, %v6914_v20  ;;  %v286_v25 = vrot.slane %v6911_v19, %v6917_v22  ;;  %v5516_v46 = vld [vmem:[%s7890_s4 + $0x124] ss:$8 sps:$4 sm:$0xff]   ;;  %v5514_v47 = vld [vmem:[%s7890_s4 + $0x120] ss:$8 sps:$4 sm:$0xff]   ;;  %v5519_v48 = vld [vmem:[%s7890_s4 + $0x134] ss:$8 sps:$4 sm:$0xff]   ;;  %v282_v7 = vrot.slane %v6911_v19, %v7003_v4 }
 0x11c   :  { %2198 = vmatprep.subr.bf16.mxu0 %v5507_v9  ;;  %v5517_v49 = vld [vmem:[%s7890_s4 + $0x130] ss:$8 sps:$4 sm:$0xff]   ;;  %v5522_v50 = vld [vmem:[%s7890_s4 + $0x144] ss:$8 sps:$4 sm:$0xff]   ;;  %v5520_v51 = vld [vmem:[%s7890_s4 + $0x140] ss:$8 sps:$4 sm:$0xff]  }
 0x11d   :  { %2475 = vmatpush1.bf16.msra.mxu1 %v5559_v16  ;;  %v5525_v52 = vld [vmem:[%s7890_s4 + $0x154] ss:$8 sps:$4 sm:$0xff]   ;;  %v5523_v53 = vld [vmem:[%s7890_s4 + $0x150] ss:$8 sps:$4 sm:$0xff]   ;;  %v5528_v54 = vld [vmem:[%s7890_s4 + $0x164] ss:$8 sps:$4 sm:$0xff]  }
 0x11e   :  { %v5526_v55 = vld [vmem:[%s7890_s4 + $0x160] ss:$8 sps:$4 sm:$0xff]   ;;  %v5531_v56 = vld [vmem:[%s7890_s4 + $0x174] ss:$8 sps:$4 sm:$0xff]   ;;  %v5529_v57 = vld [vmem:[%s7890_s4 + $0x170] ss:$8 sps:$4 sm:$0xff]  }
 0x11f   :  { %2199 = vmatpush1.bf16.msra.mxu0 %v5505_v10  ;;  %v5534_v58 = vld [vmem:[%s7890_s4 + $0x184] ss:$8 sps:$4 sm:$0xff]   ;;  %v5532_v59 = vld [vmem:[%s7890_s4 + $0x180] ss:$8 sps:$4 sm:$0xff]   ;;  %v5537_v60 = vld [vmem:[%s7890_s4 + $0x194] ss:$8 sps:$4 sm:$0xff]  }
 0x120   :  { %2209 = vmatprep.subr.bf16.mxu0 %v5510_v12  ;;  %v5535_v61 = vld [vmem:[%s7890_s4 + $0x190] ss:$8 sps:$4 sm:$0xff]   ;;  %v5540_v62 = vld [vmem:[%s7890_s4 + $0x1a4] ss:$8 sps:$4 sm:$0xff]   ;;  %v5538_v63 = vld [vmem:[%s7890_s4 + $0x1a0] ss:$8 sps:$4 sm:$0xff]  }
 0x121   :  { %v5543_v0 = vld [vmem:[%s7890_s4 + $0x1b4] ss:$8 sps:$4 sm:$0xff]   ;;  %v5541_v1 = vld [vmem:[%s7890_s4 + $0x1b0] ss:$8 sps:$4 sm:$0xff]   ;;  %v5546_v2 = vld [vmem:[%s7890_s4 + $0x1c4] ss:$8 sps:$4 sm:$0xff]  }
 0x122   :  { %v5544_v3 = vld [vmem:[%s7890_s4 + $0x1c0] ss:$8 sps:$4 sm:$0xff]   ;;  %v5549_v5 = vld [vmem:[%s7890_s4 + $0x1d4] ss:$8 sps:$4 sm:$0xff]   ;;  %v5547_v6 = vld [vmem:[%s7890_s4 + $0x1d0] ss:$8 sps:$4 sm:$0xff]  }
 0x123   :  { %v5552_v8 = vld [vmem:[%s7890_s4 + $0x1e4] ss:$8 sps:$4 sm:$0xff]   ;;  %v5550_v9 = vld [vmem:[%s7890_s4 + $0x1e0] ss:$8 sps:$4 sm:$0xff]   ;;  %v5555_v12 = vld [vmem:[%s7890_s4 + $0x1f4] ss:$8 sps:$4 sm:$0xff]  }
 0x124   :  { %v5553_v13 = vld [vmem:[%s7890_s4 + $0x1f0] ss:$8 sps:$4 sm:$0xff]   ;;  %v5564_v16 = vld [vmem:[%s7892_s6 + $0x44] ss:$16 sps:$4 sm:$0xff]  }
 0x125   :  { %v5562_v11 = vld [vmem:[%s7892_s6 + $0x40] ss:$16 sps:$4 sm:$0xff]   ;;  %2476 = vmatprep.subr.bf16.mxu1 %v5564_v16  ;;  %v5567_v19 = vld [vmem:[%s7892_s6 + $0x64] ss:$16 sps:$4 sm:$0xff]  }
 0x126   :  { %2477 = vmatpush1.bf16.msra.mxu1 %v5562_v11  ;;  %v5585_v11 = vld [vmem:[%s7892_s6 + $0x2c] ss:$16 sps:$4 sm:$0xff]  }
 0x127   :  { %2478 = vmatprep.subr.bf16.mxu1 %v5567_v19  ;;  %v5583_v19 = vld [vmem:[%s7892_s6 + $0x28] ss:$16 sps:$4 sm:$0xff]  }
 0x1b5   :  { %v1593_v26 = vpop.f32.mrb[0].mxu0  ;;  %v6925_v27 = vpop.f32.mrb[0].mxu1 }
 0x1b6   :  { %v5061_v28 = vadd.f32 %v1593_v26, %v274_v23  ;;  %v1595_v29 = vpop.f32.mrb[1].mxu0  ;;  %v1759_v30 = vpop.f32.mrb[1].mxu1  ;;  %v5063_v10 = vadd.f32 %v6925_v27, %v282_v7  ;;  %v5565_v23 = vld [vmem:[%s7892_s6 + $0x60] ss:$16 sps:$4 sm:$0xff]   ;;  %v5573_v26 = vld [vmem:[%s7892_s6 + $0xa4] ss:$16 sps:$4 sm:$0xff]  }
 0x1b7   :  { %v5062_v31 = vadd.f32 %v1595_v29, %v278_v24  ;;  %v5064_v32 = vadd.f32 %v1759_v30, %v286_v25  ;;  %v1597_v33 = vpop.f32.mrb[2].mxu0  ;;  %v1761_v34 = vpop.f32.mrb[2].mxu1  ;;  %2479 = vmatpush1.bf16.msra.mxu1 %v5565_v23  ;;  %v5570_v24 = vld [vmem:[%s7892_s6 + $0x84] ss:$16 sps:$4 sm:$0xff]   ;;  %v5568_v25 = vld [vmem:[%s7892_s6 + $0x80] ss:$16 sps:$4 sm:$0xff]  }
 0x1b8   :  { %v1764_v35 = vmax.f32 %v5061_v28, 0.0  ;;  %v1598_v36 = vpop.f32.mrb[3].mxu0  ;;  %v1762_v37 = vpop.f32.mrb[3].mxu1  ;;  %v1766_v14 = vmax.f32 %v5063_v10, 0.0  ;;  %2480 = vmatprep.subr.bf16.mxu1 %v5570_v24  ;;  %v5571_v27 = vld [vmem:[%s7892_s6 + $0xa0] ss:$16 sps:$4 sm:$0xff]  }
 0x1b9   :  { %v1765_v38 = vmax.f32 %v5062_v31, 0.0  ;;  %v1767_v39 = vmax.f32 %v5064_v32, 0.0  ;;  %v5576_v28 = vld [vmem:[%s7892_s6 + $0xc4] ss:$16 sps:$4 sm:$0xff]   ;;  %v5574_v29 = vld [vmem:[%s7892_s6 + $0xc0] ss:$16 sps:$4 sm:$0xff]  }
 0x1ba   :  { %v1768_v42 = vpack.c.bf16 %v1764_v35, %v1764_v35  ;;  %v1770_v15 = vpack.c.bf16 %v1766_v14, %v1766_v14  ;;  %v5579_v30 = vld [vmem:[%s7892_s6 + $0xe4] ss:$16 sps:$4 sm:$0xff]   ;;  %v5577_v31 = vld [vmem:[%s7892_s6 + $0xe0] ss:$16 sps:$4 sm:$0xff]   ;;  %v5582_v32 = vld [vmem:[%s7892_s6 + $0xc] ss:$16 sps:$4 sm:$0xff]  }
 0x1bb   :  { %v1769_v40 = vpack.c.bf16 %v1765_v38, %v1765_v38  ;;  %v1771_v44 = vpack.c.bf16 %v1767_v39, %v1767_v39  ;;  %2481 = vmatpush1.bf16.msra.mxu1 %v5568_v25  ;;  %v5607_v33 = vld [vmem:[%s7894_s8 + $0x8] ss:$28 sps:$4 sm:$0xff]   ;;  %v5613_v36 = vld [vmem:[%s7894_s8 + $0x40] ss:$28 sps:$4 sm:$0xff]   ;;  %v5619_v38 = vld [vmem:[%s7894_s8 + $0x78] ss:$28 sps:$4 sm:$0xff]  }
 0x1bc   :  { %2482 = vmatprep.subr.bf16.mxu1 %v5573_v26  ;;  %v5609_v34 = vld [vmem:[%s7894_s8 + $0xc] ss:$28 sps:$4 sm:$0xff]   ;;  %v5615_v35 = vld [vmem:[%s7894_s8 + $0x44] ss:$28 sps:$4 sm:$0xff]   ;;  %v5621_v37 = vld [vmem:[%s7894_s8 + $0x7c] ss:$28 sps:$4 sm:$0xff]  }
 0x1bd   :  { %2200 = vmatprep.mubr.bf16.mxu0 %v1769_v40  ;;  %v5627_v39 = vld [vmem:[%s7894_s8 + $0xb4] ss:$28 sps:$4 sm:$0xff]   ;;  %v5588_v23 = vld [vmem:[%s7892_s6 + $0x4c] ss:$16 sps:$4 sm:$0xff]   ;;  %v5586_v24 = vld [vmem:[%s7892_s6 + $0x48] ss:$16 sps:$4 sm:$0xff]  }
 0x1be   :  { %2201 = vmatmul.mubr.bf16.vlgmr.msra.gmra.mrb[4].mxu0 %v1768_v42  ;;  %v5625_v40 = vld [vmem:[%s7894_s8 + $0xb0] ss:$28 sps:$4 sm:$0xff]   ;;  %v5631_v42 = vld [vmem:[%s7894_s8 + $0xe8] ss:$28 sps:$4 sm:$0xff]  }
 0x1bf   :  { %2210 = vmatpush1.bf16.msra.mxu0 %v5508_v41  ;;  %2241 = vmatprep.mubr.bf16.mxu0 %v1771_v44  ;;  %v5633_v41 = vld [vmem:[%s7894_s8 + $0xec] ss:$28 sps:$4 sm:$0xff]   ;;  %v5637_v44 = vld [vmem:[%s7894_s8 + $0x120] ss:$28 sps:$4 sm:$0xff]  }
 0x1c0   :  { %2211 = vmatprep.subr.bf16.mxu0 %v5513_v43  ;;  %2483 = vmatpush1.bf16.msra.mxu1 %v5571_v27  ;;  %v5639_v43 = vld [vmem:[%s7894_s8 + $0x124] ss:$28 sps:$4 sm:$0xff]   ;;  %v5591_v25 = vld [vmem:[%s7892_s6 + $0x6c] ss:$16 sps:$4 sm:$0xff]   ;;  %v5592_v27 = vld [vmem:[%s7892_s6 + $0x88] ss:$16 sps:$4 sm:$0xff]  }
 0x1c1   :  { %2484 = vmatprep.subr.bf16.mxu1 %v5576_v28  ;;  %v5594_v26 = vld [vmem:[%s7892_s6 + $0x8c] ss:$16 sps:$4 sm:$0xff]  }
 0x1c2   :  { %v5597_v28 = vld [vmem:[%s7892_s6 + $0xac] ss:$16 sps:$4 sm:$0xff]  }
 0x1c3   :  { %2212 = vmatpush1.bf16.msra.mxu0 %v5511_v45  ;;  %v5645_v45 = vld [vmem:[%s7894_s8 + $0x15c] ss:$28 sps:$4 sm:$0xff]  }
 0x1c4   :  { %2213 = vmatprep.subr.bf16.mxu0 %v5516_v46  ;;  %2485 = vmatpush1.bf16.msra.mxu1 %v5574_v29  ;;  %v5643_v46 = vld [vmem:[%s7894_s8 + $0x158] ss:$28 sps:$4 sm:$0xff]  }
 0x1c5   :  { %2486 = vmatprep.subr.bf16.mxu1 %v5579_v30  ;;  %v5595_v29 = vld [vmem:[%s7892_s6 + $0xa8] ss:$16 sps:$4 sm:$0xff]   ;;  %v5600_v30 = vld [vmem:[%s7892_s6 + $0xcc] ss:$16 sps:$4 sm:$0xff]  }
 0x1c7   :  { %2214 = vmatpush1.bf16.msra.mxu0 %v5514_v47  ;;  %v5651_v47 = vld [vmem:[%s7894_s8 + $0x194] ss:$28 sps:$4 sm:$0xff]  }
 0x1c8   :  { %2215 = vmatprep.subr.bf16.mxu0 %v5519_v48  ;;  %2487 = vmatpush1.bf16.msra.mxu1 %v5577_v31  ;;  %v5649_v48 = vld [vmem:[%s7894_s8 + $0x190] ss:$28 sps:$4 sm:$0xff]   ;;  %v5598_v31 = vld [vmem:[%s7892_s6 + $0xc8] ss:$16 sps:$4 sm:$0xff]  }
 0x1c9   :  { %2513 = vmatprep.subr.bf16.mxu1 %v5582_v32  ;;  %v5603_v32 = vld [vmem:[%s7892_s6 + $0xec] ss:$16 sps:$4 sm:$0xff]  }
 0x1cb   :  { %2216 = vmatpush1.bf16.msra.mxu0 %v5517_v49  ;;  %v5657_v49 = vld [vmem:[%s7894_s8 + $0x1cc] ss:$28 sps:$4 sm:$0xff]  }
 0x1cc   :  { %2217 = vmatprep.subr.bf16.mxu0 %v5522_v50  ;;  %v5655_v50 = vld [vmem:[%s7894_s8 + $0x1c8] ss:$28 sps:$4 sm:$0xff]  }
 0x1cf   :  { %2218 = vmatpush1.bf16.msra.mxu0 %v5520_v51  ;;  %v5663_v51 = vld [vmem:[%s7894_s8 + $0x204] ss:$28 sps:$4 sm:$0xff]  }
 0x1d0   :  { %2219 = vmatprep.subr.bf16.mxu0 %v5525_v52  ;;  %v5661_v52 = vld [vmem:[%s7894_s8 + $0x200] ss:$28 sps:$4 sm:$0xff]  }
 0x1d3   :  { %2220 = vmatpush1.bf16.msra.mxu0 %v5523_v53  ;;  %v5669_v53 = vld [vmem:[%s7894_s8 + $0x23c] ss:$28 sps:$4 sm:$0xff]  }
 0x1d4   :  { %2221 = vmatprep.subr.bf16.mxu0 %v5528_v54  ;;  %v5667_v54 = vld [vmem:[%s7894_s8 + $0x238] ss:$28 sps:$4 sm:$0xff]  }
 0x1d7   :  { %2222 = vmatpush1.bf16.msra.mxu0 %v5526_v55  ;;  %v5675_v55 = vld [vmem:[%s7894_s8 + $0x274] ss:$28 sps:$4 sm:$0xff]  }
 0x1d8   :  { %2223 = vmatprep.subr.bf16.mxu0 %v5531_v56  ;;  %v5673_v56 = vld [vmem:[%s7894_s8 + $0x270] ss:$28 sps:$4 sm:$0xff]  }
 0x1db   :  { %2224 = vmatpush1.bf16.msra.mxu0 %v5529_v57  ;;  %v5681_v57 = vld [vmem:[%s7894_s8 + $0x2ac] ss:$28 sps:$4 sm:$0xff]  }
 0x1dc   :  { %2225 = vmatprep.subr.bf16.mxu0 %v5534_v58  ;;  %v5679_v58 = vld [vmem:[%s7894_s8 + $0x2a8] ss:$28 sps:$4 sm:$0xff]  }
 0x1df   :  { %2226 = vmatpush1.bf16.msra.mxu0 %v5532_v59  ;;  %v5687_v59 = vld [vmem:[%s7894_s8 + $0x2e4] ss:$28 sps:$4 sm:$0xff]  }
 0x1e0   :  { %2227 = vmatprep.subr.bf16.mxu0 %v5537_v60  ;;  %v5685_v60 = vld [vmem:[%s7894_s8 + $0x2e0] ss:$28 sps:$4 sm:$0xff]  }
 0x1e3   :  { %2228 = vmatpush1.bf16.msra.mxu0 %v5535_v61  ;;  %v1836_v61 = vld [vmem:[%s7891_s5] sm:$0x3] }
 0x1e4   :  { %2229 = vmatprep.subr.bf16.mxu0 %v5540_v62  ;;  %v1841_v62 = vrot.slane %v1836_v61, %v6906_v18 }
 0x1e7   :  { %2230 = vmatpush1.bf16.msra.mxu0 %v5538_v63  ;;  %v1845_v63 = vrot.slane %v1836_v61, %v6914_v20  ;;  %v5682_v61 = vld [vmem:[%s7894_s8 + $0x2d8] ss:$28 sps:$4 sm:$0xff]  }
 0x1e8   :  { %2231 = vmatprep.subr.bf16.mxu0 %v5543_v0 }
 0x1eb   :  { %2232 = vmatpush1.bf16.msra.mxu0 %v5541_v1 }
 0x1ec   :  { %2233 = vmatprep.subr.bf16.mxu0 %v5546_v2 }
 0x1ef   :  { %2234 = vmatpush1.bf16.msra.mxu0 %v5544_v3 }
 0x1f0   :  { %2235 = vmatprep.subr.bf16.mxu0 %v5549_v5 }
 0x1f3   :  { %2236 = vmatpush1.bf16.msra.mxu0 %v5547_v6 }
 0x1f4   :  { %2237 = vmatprep.subr.bf16.mxu0 %v5552_v8 }
 0x1f7   :  { %2238 = vmatpush1.bf16.msra.mxu0 %v5550_v9  ;;  %v2250_v9 = vld [vmem:[%s7887_s1] sm:$0xf] }
 0x1f8   :  { %2239 = vmatprep.subr.bf16.mxu0 %v5555_v12  ;;  %v2251_v10 = vunpack.c.l.bf16 %v2250_v9  ;;  %v7320_v9 = vld [vmem:[%s7893_s7] sm:$0xf] }
 0x1fb   :  { %2240 = vmatpush1.bf16.msra.mxu0 %v5553_v13 }
 0x1fc   :  { %4089 = vmatprep.subr.bf16.mxu0 %v5609_v34  ;;  %v5606_v34 = vld [vmem:[%s7894_s8 + $0x4] ss:$28 sps:$4 sm:$0xff]  }
 0x1fe   :  { %2242 = vmatmul.mubr.bf16.vlgmr.msra.gmra.mrb[4].mxu0 %v1770_v15  ;;  %v5580_v15 = vld [vmem:[%s7892_s6 + $0x8] ss:$16 sps:$4 sm:$0xff]  }
 0x1ff   :  { %4090 = vmatpush1.bf16.msra.mxu0 %v5607_v33  ;;  %v5601_v33 = vld [vmem:[%s7892_s6 + $0xe8] ss:$16 sps:$4 sm:$0xff]  }
 0x200   :  { %4091 = vmatprep.subr.bf16.mxu0 %v5615_v35  ;;  %v5604_v35 = vld [vmem:[%s7894_s8] ss:$28 sps:$4 sm:$0xff]  }
 0x203   :  { %4092 = vmatpush1.bf16.msra.mxu0 %v5613_v36  ;;  %v5612_v36 = vld [vmem:[%s7894_s8 + $0x3c] ss:$28 sps:$4 sm:$0xff]  }
 0x204   :  { %4093 = vmatprep.subr.bf16.mxu0 %v5621_v37  ;;  %v5610_v37 = vld [vmem:[%s7894_s8 + $0x38] ss:$28 sps:$4 sm:$0xff]  }
 0x207   :  { %4094 = vmatpush1.bf16.msra.mxu0 %v5619_v38  ;;  %v5618_v38 = vld [vmem:[%s7894_s8 + $0x74] ss:$28 sps:$4 sm:$0xff]  }
 0x208   :  { %4095 = vmatprep.subr.bf16.mxu0 %v5627_v39  ;;  %v5616_v39 = vld [vmem:[%s7894_s8 + $0x70] ss:$28 sps:$4 sm:$0xff]  }
 0x20b   :  { %4096 = vmatpush1.bf16.msra.mxu0 %v5625_v40  ;;  %v5624_v40 = vld [vmem:[%s7894_s8 + $0xac] ss:$28 sps:$4 sm:$0xff]  }
 0x20c   :  { %4097 = vmatprep.subr.bf16.mxu0 %v5633_v41  ;;  %v5622_v41 = vld [vmem:[%s7894_s8 + $0xa8] ss:$28 sps:$4 sm:$0xff]  }
 0x20f   :  { %4098 = vmatpush1.bf16.msra.mxu0 %v5631_v42  ;;  %v5630_v42 = vld [vmem:[%s7894_s8 + $0xe4] ss:$28 sps:$4 sm:$0xff]  }
 0x210   :  { %4099 = vmatprep.subr.bf16.mxu0 %v5639_v43  ;;  %v5628_v43 = vld [vmem:[%s7894_s8 + $0xe0] ss:$28 sps:$4 sm:$0xff]  }
 0x213   :  { %4100 = vmatpush1.bf16.msra.mxu0 %v5637_v44  ;;  %v5636_v44 = vld [vmem:[%s7894_s8 + $0x11c] ss:$28 sps:$4 sm:$0xff]  }
 0x214   :  { %4101 = vmatprep.subr.bf16.mxu0 %v5645_v45  ;;  %v5634_v45 = vld [vmem:[%s7894_s8 + $0x118] ss:$28 sps:$4 sm:$0xff]  }
 0x217   :  { %4102 = vmatpush1.bf16.msra.mxu0 %v5643_v46  ;;  %v5642_v46 = vld [vmem:[%s7894_s8 + $0x154] ss:$28 sps:$4 sm:$0xff]  }
 0x218   :  { %4103 = vmatprep.subr.bf16.mxu0 %v5651_v47  ;;  %v5640_v47 = vld [vmem:[%s7894_s8 + $0x150] ss:$28 sps:$4 sm:$0xff]  }
 0x21b   :  { %4104 = vmatpush1.bf16.msra.mxu0 %v5649_v48  ;;  %v5648_v48 = vld [vmem:[%s7894_s8 + $0x18c] ss:$28 sps:$4 sm:$0xff]  }
 0x21c   :  { %4105 = vmatprep.subr.bf16.mxu0 %v5657_v49  ;;  %v5646_v49 = vld [vmem:[%s7894_s8 + $0x188] ss:$28 sps:$4 sm:$0xff]  }
 0x21f   :  { %4106 = vmatpush1.bf16.msra.mxu0 %v5655_v50  ;;  %v5654_v50 = vld [vmem:[%s7894_s8 + $0x1c4] ss:$28 sps:$4 sm:$0xff]  }
 0x220   :  { %4107 = vmatprep.subr.bf16.mxu0 %v5663_v51  ;;  %v5652_v51 = vld [vmem:[%s7894_s8 + $0x1c0] ss:$28 sps:$4 sm:$0xff]  }
 0x223   :  { %4108 = vmatpush1.bf16.msra.mxu0 %v5661_v52  ;;  %v5660_v52 = vld [vmem:[%s7894_s8 + $0x1fc] ss:$28 sps:$4 sm:$0xff]  }
 0x224   :  { %4109 = vmatprep.subr.bf16.mxu0 %v5669_v53  ;;  %v5658_v53 = vld [vmem:[%s7894_s8 + $0x1f8] ss:$28 sps:$4 sm:$0xff]  }
 0x227   :  { %4110 = vmatpush1.bf16.msra.mxu0 %v5667_v54  ;;  %v5666_v54 = vld [vmem:[%s7894_s8 + $0x234] ss:$28 sps:$4 sm:$0xff]  }
 0x228   :  { %4111 = vmatprep.subr.bf16.mxu0 %v5675_v55  ;;  %v5664_v55 = vld [vmem:[%s7894_s8 + $0x230] ss:$28 sps:$4 sm:$0xff]  }
 0x22b   :  { %4112 = vmatpush1.bf16.msra.mxu0 %v5673_v56  ;;  %v5672_v56 = vld [vmem:[%s7894_s8 + $0x26c] ss:$28 sps:$4 sm:$0xff]  }
 0x22c   :  { %4113 = vmatprep.subr.bf16.mxu0 %v5681_v57  ;;  %v5670_v57 = vld [vmem:[%s7894_s8 + $0x268] ss:$28 sps:$4 sm:$0xff]  }
 0x22f   :  { %4114 = vmatpush1.bf16.msra.mxu0 %v5679_v58  ;;  %v5678_v58 = vld [vmem:[%s7894_s8 + $0x2a4] ss:$28 sps:$4 sm:$0xff]  }
 0x230   :  { %4115 = vmatprep.subr.bf16.mxu0 %v5687_v59  ;;  %v5676_v59 = vld [vmem:[%s7894_s8 + $0x2a0] ss:$28 sps:$4 sm:$0xff]  }
 0x233   :  { %4116 = vmatpush1.bf16.msra.mxu0 %v5685_v60  ;;  %v5684_v60 = vld [vmem:[%s7894_s8 + $0x2dc] ss:$28 sps:$4 sm:$0xff]  }
 0x2d1   :  { %v2243_v0 = vpop.f32.mrb[4].mxu0 }
 0x2d2   :  { %v5065_v1 = vadd.f32 %v2243_v0, %v1841_v62  ;;  %v2245_v2 = vpop.f32.mrb[5].mxu0  ;;  %v5690_v62 = vld [vmem:[%s7894_s8 + $0x314] ss:$28 sps:$4 sm:$0xff]  }
 0x2d3   :  { %v5066_v3 = vadd.f32 %v2245_v2, %v1845_v63  ;;  %v2247_v5 = vpop.f32.mrb[6].mxu0  ;;  %v5693_v63 = vld [vmem:[%s7894_s8 + $0x31c] ss:$28 sps:$4 sm:$0xff]   ;;  %v5696_v2 = vld [vmem:[%s7894_s8 + $0x34c] ss:$28 sps:$4 sm:$0xff]  }
 0x2d4   :  { %4408 = vst [vmem:[#allocation4] sm:$0xff] %v5065_v1  ;;  %v2248_v6 = vpop.f32.mrb[7].mxu0  ;;  %v5691_v0 = vld [vmem:[%s7894_s8 + $0x318] ss:$28 sps:$4 sm:$0xff]   ;;  %4117 = vmatprep.subr.bf16.mxu0 %v5693_v63  ;;  %v5697_v5 = vld [vmem:[%s7894_s8 + $0x350] ss:$28 sps:$4 sm:$0xff]  }
 0x2d5   :  { %v2252_v7 = vmul.f32 0.5, %v5066_v3  ;;  %4409 = vst [vmem:[#allocation6] sm:$0xff] %v5066_v3  ;;  %4118 = vmatpush1.bf16.msra.mxu0 %v5691_v0  ;;  %v5699_v3 = vld [vmem:[%s7894_s8 + $0x354] ss:$28 sps:$4 sm:$0xff]   ;;  %v5694_v6 = vld [vmem:[%s7894_s8 + $0x348] ss:$28 sps:$4 sm:$0xff]  }
 0x2d6   :  { %4119 = vmatprep.subr.bf16.mxu0 %v5699_v3  ;;  %v5753_v63 = vld [vmem:[%s7894_s8 + $0x54c] ss:$28 sps:$4 sm:$0xff]  }
 0x2d7   :  { %v2253_v8 = vmul.f32 1.442695, %v2252_v7  ;;  %v5702_v7 = vld [vmem:[%s7894_s8 + $0x384] ss:$28 sps:$4 sm:$0xff]  }
 0x2d8   :  { %v5751_v3 = vld [vmem:[%s7894_s8 + $0x548] ss:$28 sps:$4 sm:$0xff]  }
 0x2d9   :  { %5924 = vpow2.f32 %v2253_v8  ;;  %4120 = vmatpush1.bf16.msra.mxu0 %v5697_v5  ;;  %v5705_v8 = vld [vmem:[%s7894_s8 + $0x38c] ss:$28 sps:$4 sm:$0xff]   ;;  %v5756_v5 = vld [vmem:[%s7894_s8 + $0x57c] ss:$28 sps:$4 sm:$0xff]  }
 0x2da   :  { %4130 = vmatprep.subr.bf16.mxu0 %v5705_v8  ;;  %v5757_v8 = vld [vmem:[%s7894_s8 + $0x580] ss:$28 sps:$4 sm:$0xff]  }
 0x2e3   :  { %v5925_v12 = vpop.eup %5924 }
 0x2e4   :  { %v2255_v13 = vmul.f32 %v5925_v12, %v2251_v10  ;;  %v2295_v10 = vrot.slane %v7320_v9, %v6906_v18  ;;  %v2299_v12 = vrot.slane %v7320_v9, %v6914_v20 }
 0x2e6   :  { %v2256_v14 = vadd.f32 %v5065_v1, %v2255_v13  ;;  %v5688_v1 = vld [vmem:[%s7894_s8 + $0x310] ss:$28 sps:$4 sm:$0xff]  }
 0x2e8   :  { %v2257_v16 = vpack.c.bf16 %v2256_v14, %v2256_v14 }
 0x2ea   :  { %2505 = vmatmul.mubr.bf16.vlgmr.msra.gmra.mrb[4].mxu1 %v2257_v16 }
 0x2eb   :  { %2514 = vmatpush1.bf16.msra.mxu1 %v5580_v15  ;;  %2545 = vmatprep.mubr.bf16.mxu1 %v6024_v21  ;;  %v5589_v21 = vld [vmem:[%s7892_s6 + $0x68] ss:$16 sps:$4 sm:$0xff]  }
 0x2ec   :  { %2515 = vmatprep.subr.bf16.mxu1 %v5585_v11 }
 0x2ef   :  { %2516 = vmatpush1.bf16.msra.mxu1 %v5583_v19 }
 0x2f0   :  { %2517 = vmatprep.subr.bf16.mxu1 %v5588_v23 }
 0x2f3   :  { %2518 = vmatpush1.bf16.msra.mxu1 %v5586_v24 }
 0x2f4   :  { %2519 = vmatprep.subr.bf16.mxu1 %v5591_v25 }
 0x2f7   :  { %2520 = vmatpush1.bf16.msra.mxu1 %v5589_v21  ;;  %v5700_v21 = vld [vmem:[%s7894_s8 + $0x380] ss:$28 sps:$4 sm:$0xff]  }
 0x2f8   :  { %2521 = vmatprep.subr.bf16.mxu1 %v5594_v26  ;;  %v5703_v26 = vld [vmem:[%s7894_s8 + $0x388] ss:$28 sps:$4 sm:$0xff]  }
 0x2fb   :  { %2522 = vmatpush1.bf16.msra.mxu1 %v5592_v27 }
 0x2fc   :  { %2523 = vmatprep.subr.bf16.mxu1 %v5597_v28  ;;  %v5708_v28 = vld [vmem:[%s7894_s8 + $0x3bc] ss:$28 sps:$4 sm:$0xff]  }
 0x2ff   :  { %2524 = vmatpush1.bf16.msra.mxu1 %v5595_v29  ;;  %v5711_v29 = vld [vmem:[%s7894_s8 + $0x3c4] ss:$28 sps:$4 sm:$0xff]  }
 0x300   :  { %2525 = vmatprep.subr.bf16.mxu1 %v5600_v30  ;;  %v5706_v30 = vld [vmem:[%s7894_s8 + $0x3b8] ss:$28 sps:$4 sm:$0xff]  }
 0x303   :  { %2526 = vmatpush1.bf16.msra.mxu1 %v5598_v31  ;;  %v5709_v31 = vld [vmem:[%s7894_s8 + $0x3c0] ss:$28 sps:$4 sm:$0xff]  }
 0x304   :  { %2527 = vmatprep.subr.bf16.mxu1 %v5603_v32  ;;  %v5714_v32 = vld [vmem:[%s7894_s8 + $0x3f4] ss:$28 sps:$4 sm:$0xff]  }
 0x307   :  { %2528 = vmatpush1.bf16.msra.mxu1 %v5601_v33  ;;  %v5717_v33 = vld [vmem:[%s7894_s8 + $0x3fc] ss:$28 sps:$4 sm:$0xff]  }
 0x308   :  { %4007 = vmatprep.subr.bf16.mxu1 %v5606_v34  ;;  %v5712_v34 = vld [vmem:[%s7894_s8 + $0x3f0] ss:$28 sps:$4 sm:$0xff]  }
 0x30a   :  { %2546 = vmatmul.mubr.bf16.vlgmr.msra.gmra.mrb[8].mxu1 %v2257_v16 }
 0x30b   :  { %4008 = vmatpush1.bf16.msra.mxu1 %v5604_v35  ;;  %v5715_v35 = vld [vmem:[%s7894_s8 + $0x3f8] ss:$28 sps:$4 sm:$0xff]  }
 0x30c   :  { %4009 = vmatprep.subr.bf16.mxu1 %v5612_v36  ;;  %v5720_v36 = vld [vmem:[%s7894_s8 + $0x42c] ss:$28 sps:$4 sm:$0xff]  }
 0x30f   :  { %4010 = vmatpush1.bf16.msra.mxu1 %v5610_v37  ;;  %v5723_v37 = vld [vmem:[%s7894_s8 + $0x434] ss:$28 sps:$4 sm:$0xff]  }
 0x310   :  { %4011 = vmatprep.subr.bf16.mxu1 %v5618_v38  ;;  %v5718_v38 = vld [vmem:[%s7894_s8 + $0x428] ss:$28 sps:$4 sm:$0xff]  }
 0x313   :  { %4012 = vmatpush1.bf16.msra.mxu1 %v5616_v39  ;;  %v5721_v39 = vld [vmem:[%s7894_s8 + $0x430] ss:$28 sps:$4 sm:$0xff]  }
 0x314   :  { %4013 = vmatprep.subr.bf16.mxu1 %v5624_v40  ;;  %v5726_v40 = vld [vmem:[%s7894_s8 + $0x464] ss:$28 sps:$4 sm:$0xff]  }
 0x317   :  { %4014 = vmatpush1.bf16.msra.mxu1 %v5622_v41  ;;  %v5729_v41 = vld [vmem:[%s7894_s8 + $0x46c] ss:$28 sps:$4 sm:$0xff]  }
 0x318   :  { %4015 = vmatprep.subr.bf16.mxu1 %v5630_v42  ;;  %v5724_v42 = vld [vmem:[%s7894_s8 + $0x460] ss:$28 sps:$4 sm:$0xff]  }
 0x31b   :  { %4016 = vmatpush1.bf16.msra.mxu1 %v5628_v43  ;;  %v5727_v43 = vld [vmem:[%s7894_s8 + $0x468] ss:$28 sps:$4 sm:$0xff]  }
 0x31c   :  { %4017 = vmatprep.subr.bf16.mxu1 %v5636_v44  ;;  %v5732_v44 = vld [vmem:[%s7894_s8 + $0x49c] ss:$28 sps:$4 sm:$0xff]  }
 0x31f   :  { %4018 = vmatpush1.bf16.msra.mxu1 %v5634_v45  ;;  %v5735_v45 = vld [vmem:[%s7894_s8 + $0x4a4] ss:$28 sps:$4 sm:$0xff]  }
 0x320   :  { %4019 = vmatprep.subr.bf16.mxu1 %v5642_v46  ;;  %v5730_v46 = vld [vmem:[%s7894_s8 + $0x498] ss:$28 sps:$4 sm:$0xff]  }
 0x323   :  { %4020 = vmatpush1.bf16.msra.mxu1 %v5640_v47  ;;  %v5733_v47 = vld [vmem:[%s7894_s8 + $0x4a0] ss:$28 sps:$4 sm:$0xff]  }
 0x324   :  { %4021 = vmatprep.subr.bf16.mxu1 %v5648_v48  ;;  %v5738_v48 = vld [vmem:[%s7894_s8 + $0x4d4] ss:$28 sps:$4 sm:$0xff]  }
 0x327   :  { %4022 = vmatpush1.bf16.msra.mxu1 %v5646_v49  ;;  %v5741_v49 = vld [vmem:[%s7894_s8 + $0x4dc] ss:$28 sps:$4 sm:$0xff]  }
 0x328   :  { %4023 = vmatprep.subr.bf16.mxu1 %v5654_v50  ;;  %v2307_v50 = vrot.slane %v7320_v9, %v6917_v22 }
 0x32b   :  { %4024 = vmatpush1.bf16.msra.mxu1 %v5652_v51  ;;  %v5736_v51 = vld [vmem:[%s7894_s8 + $0x4d0] ss:$28 sps:$4 sm:$0xff]  }
 0x32c   :  { %4025 = vmatprep.subr.bf16.mxu1 %v5660_v52  ;;  %v5739_v52 = vld [vmem:[%s7894_s8 + $0x4d8] ss:$28 sps:$4 sm:$0xff]  }
 0x32f   :  { %4026 = vmatpush1.bf16.msra.mxu1 %v5658_v53  ;;  %v5744_v53 = vld [vmem:[%s7894_s8 + $0x50c] ss:$28 sps:$4 sm:$0xff]  }
 0x330   :  { %4027 = vmatprep.subr.bf16.mxu1 %v5666_v54  ;;  %v5747_v54 = vld [vmem:[%s7894_s8 + $0x514] ss:$28 sps:$4 sm:$0xff]  }
 0x333   :  { %4028 = vmatpush1.bf16.msra.mxu1 %v5664_v55 }
 0x334   :  { %4029 = vmatprep.subr.bf16.mxu1 %v5672_v56 }
 0x337   :  { %4030 = vmatpush1.bf16.msra.mxu1 %v5670_v57 }
 0x338   :  { %4031 = vmatprep.subr.bf16.mxu1 %v5678_v58 }
 0x33b   :  { %4032 = vmatpush1.bf16.msra.mxu1 %v5676_v59  ;;  %v5742_v59 = vld [vmem:[%s7894_s8 + $0x508] ss:$28 sps:$4 sm:$0xff]  }
 0x33c   :  { %4033 = vmatprep.subr.bf16.mxu1 %v5684_v60  ;;  %v5745_v60 = vld [vmem:[%s7894_s8 + $0x510] ss:$28 sps:$4 sm:$0xff]  }
 0x33f   :  { %4034 = vmatpush1.bf16.msra.mxu1 %v5682_v61 }
 0x340   :  { %4035 = vmatprep.subr.bf16.mxu1 %v5690_v62  ;;  %v5750_v62 = vld [vmem:[%s7894_s8 + $0x544] ss:$28 sps:$4 sm:$0xff]  }
 0x343   :  { %4036 = vmatpush1.bf16.msra.mxu1 %v5688_v1 }
 0x344   :  { %4037 = vmatprep.subr.bf16.mxu1 %v5696_v2  ;;  %v5748_v2 = vld [vmem:[%s7894_s8 + $0x540] ss:$28 sps:$4 sm:$0xff]  }
 0x347   :  { %4038 = vmatpush1.bf16.msra.mxu1 %v5694_v6  ;;  %v5759_v6 = vld [vmem:[%s7894_s8 + $0x584] ss:$28 sps:$4 sm:$0xff]  }
 0x348   :  { %4048 = vmatprep.subr.bf16.mxu1 %v5702_v7  ;;  %v5754_v7 = vld [vmem:[%s7894_s8 + $0x578] ss:$28 sps:$4 sm:$0xff]  }
 0x3bd   :  { %v2506_v13 = vpop.f32.mrb[4].mxu1 }
 0x3be   :  { %v2507_v14 = vadd.f32 %v2506_v13, %v2295_v10  ;;  %v2508_v15 = vpop.f32.mrb[5].mxu1  ;;  %v5762_v10 = vld [vmem:[%s7894_s8 + $0x5b4] ss:$28 sps:$4 sm:$0xff]  }
 0x3bf   :  { %v2509_v16 = vadd.f32 %v2508_v15, %v2299_v12  ;;  %v2510_v11 = vpop.f32.mrb[6].mxu1  ;;  %v5765_v12 = vld [vmem:[%s7894_s8 + $0x5bc] ss:$28 sps:$4 sm:$0xff]   ;;  %v5760_v13 = vld [vmem:[%s7894_s8 + $0x5b0] ss:$28 sps:$4 sm:$0xff]  }
 0x3c0   :  { %v2554_v19 = vmax.f32 %v2507_v14, 0.0  ;;  %v2511_v23 = vpop.f32.mrb[7].mxu1  ;;  %v5763_v14 = vld [vmem:[%s7894_s8 + $0x5b8] ss:$28 sps:$4 sm:$0xff]   ;;  %v5768_v15 = vld [vmem:[%s7894_s8 + $0x5ec] ss:$28 sps:$4 sm:$0xff]  }
 0x3c1   :  { %v2555_v24 = vmax.f32 %v2509_v16, 0.0  ;;  %v5771_v16 = vld [vmem:[%s7894_s8 + $0x5f4] ss:$28 sps:$4 sm:$0xff]   ;;  %v5766_v11 = vld [vmem:[%s7894_s8 + $0x5e8] ss:$28 sps:$4 sm:$0xff]  }
 0x3c2   :  { %v7334_v27 = vpack.c.bf16 %v2554_v19, %v2554_v19  ;;  %v5769_v19 = vld [vmem:[%s7894_s8 + $0x5f0] ss:$28 sps:$4 sm:$0xff]   ;;  %v5774_v23 = vld [vmem:[%s7894_s8 + $0x624] ss:$28 sps:$4 sm:$0xff]  }
 0x3c3   :  { %v7326_v25 = vpack.c.bf16 %v2555_v24, %v2555_v24  ;;  %v5777_v24 = vld [vmem:[%s7894_s8 + $0x62c] ss:$28 sps:$4 sm:$0xff]  }
 0x3c5   :  { %4039 = vmatprep.mubr.bf16.mxu1 %v7326_v25  ;;  %4121 = vmatprep.mubr.bf16.mxu0 %v7326_v25 }
 0x3c6   :  { %4040 = vmatmul.mubr.bf16.vlgmr.msra.gmra.mrb[12].mxu1 %v7334_v27  ;;  %4122 = vmatmul.mubr.bf16.vlgmr.msra.gmra.mrb[8].mxu0 %v7334_v27 }
 0x3c7   :  { %4049 = vmatpush1.bf16.msra.mxu1 %v5700_v21  ;;  %4131 = vmatpush1.bf16.msra.mxu0 %v5703_v26  ;;  %v5772_v21 = vld [vmem:[%s7894_s8 + $0x620] ss:$28 sps:$4 sm:$0xff]   ;;  %v5775_v26 = vld [vmem:[%s7894_s8 + $0x628] ss:$28 sps:$4 sm:$0xff]  }
 0x3c8   :  { %4050 = vmatprep.subr.bf16.mxu1 %v5708_v28  ;;  %4132 = vmatprep.subr.bf16.mxu0 %v5711_v29  ;;  %v5780_v28 = vld [vmem:[%s7894_s8 + $0x65c] ss:$28 sps:$4 sm:$0xff]   ;;  %v5783_v29 = vld [vmem:[%s7894_s8 + $0x664] ss:$28 sps:$4 sm:$0xff]  }
 0x3cb   :  { %4051 = vmatpush1.bf16.msra.mxu1 %v5706_v30  ;;  %4133 = vmatpush1.bf16.msra.mxu0 %v5709_v31  ;;  %v5778_v30 = vld [vmem:[%s7894_s8 + $0x658] ss:$28 sps:$4 sm:$0xff]   ;;  %v5781_v31 = vld [vmem:[%s7894_s8 + $0x660] ss:$28 sps:$4 sm:$0xff]  }
 0x3cc   :  { %4052 = vmatprep.subr.bf16.mxu1 %v5714_v32  ;;  %4134 = vmatprep.subr.bf16.mxu0 %v5717_v33  ;;  %v2303_v32 = vrot.slane %v7320_v9, %v7003_v4  ;;  %v5786_v33 = vld [vmem:[%s7894_s8 + $0x694] ss:$28 sps:$4 sm:$0xff]  }
 0x3cd   :  { %v5787_v9 = vld [vmem:[%s7894_s8 + $0x698] ss:$28 sps:$4 sm:$0xff]  }
 0x3cf   :  { %4053 = vmatpush1.bf16.msra.mxu1 %v5712_v34  ;;  %4135 = vmatpush1.bf16.msra.mxu0 %v5715_v35  ;;  %v5789_v34 = vld [vmem:[%s7894_s8 + $0x69c] ss:$28 sps:$4 sm:$0xff]   ;;  %v5784_v35 = vld [vmem:[%s7894_s8 + $0x690] ss:$28 sps:$4 sm:$0xff]  }
 0x3d0   :  { %4054 = vmatprep.subr.bf16.mxu1 %v5720_v36  ;;  %4136 = vmatprep.subr.bf16.mxu0 %v5723_v37  ;;  %v5792_v37 = vld [vmem:[%s7894_s8 + $0x6cc] ss:$28 sps:$4 sm:$0xff]  }
 0x3d3   :  { %4055 = vmatpush1.bf16.msra.mxu1 %v5718_v38  ;;  %4137 = vmatpush1.bf16.msra.mxu0 %v5721_v39  ;;  %v5795_v38 = vld [vmem:[%s7894_s8 + $0x6d4] ss:$28 sps:$4 sm:$0xff]   ;;  %v5790_v39 = vld [vmem:[%s7894_s8 + $0x6c8] ss:$28 sps:$4 sm:$0xff]  }
 0x3d4   :  { %4056 = vmatprep.subr.bf16.mxu1 %v5726_v40  ;;  %4138 = vmatprep.subr.bf16.mxu0 %v5729_v41  ;;  %v5793_v40 = vld [vmem:[%s7894_s8 + $0x6d0] ss:$28 sps:$4 sm:$0xff]  }
 0x3d7   :  { %4057 = vmatpush1.bf16.msra.mxu1 %v5724_v42  ;;  %4139 = vmatpush1.bf16.msra.mxu0 %v5727_v43  ;;  %v5798_v42 = vld [vmem:[%s7894_s8 + $0x14] ss:$28 sps:$4 sm:$0xff]  }
 0x3d8   :  { %4058 = vmatprep.subr.bf16.mxu1 %v5732_v44  ;;  %4140 = vmatprep.subr.bf16.mxu0 %v5735_v45  ;;  %v5799_v43 = vld [vmem:[%s7894_s8 + $0x1d8] ss:$28 sps:$4 sm:$0xff]   ;;  %v5796_v44 = vld [vmem:[%s7894_s8 + $0x10] ss:$28 sps:$4 sm:$0xff]  }
 0x3db   :  { %4059 = vmatpush1.bf16.msra.mxu1 %v5730_v46  ;;  %4141 = vmatpush1.bf16.msra.mxu0 %v5733_v47  ;;  %v5800_v46 = vld [vmem:[%s7894_s8 + $0x18] ss:$28 sps:$4 sm:$0xff]   ;;  %v5803_v47 = vld [vmem:[%s7894_s8 + $0x4c] ss:$28 sps:$4 sm:$0xff]  }
 0x3dc   :  { %4060 = vmatprep.subr.bf16.mxu1 %v5738_v48  ;;  %4142 = vmatprep.subr.bf16.mxu0 %v5741_v49  ;;  %v5804_v48 = vld [vmem:[%s7894_s8 + $0x210] ss:$28 sps:$4 sm:$0xff]   ;;  %v5801_v49 = vld [vmem:[%s7894_s8 + $0x48] ss:$28 sps:$4 sm:$0xff]  }
 0x3dd   :  { %v7420_v55 = vpop.f32.mrb[8].mxu1 }
 0x3de   :  { %v2549_v56 = vpop.f32.mrb[9].mxu1  ;;  %v2548_v36 = vadd.f32 %v7420_v55, %v2303_v32  ;;  %v5814_v55 = vld [vmem:[%s7894_s8 + $0x280] ss:$28 sps:$4 sm:$0xff]  }
 0x3df   :  { %v2550_v57 = vadd.f32 %v2549_v56, %v2307_v50  ;;  %v2551_v58 = vpop.f32.mrb[10].mxu1  ;;  %4061 = vmatpush1.bf16.msra.mxu1 %v5736_v51  ;;  %4143 = vmatpush1.bf16.msra.mxu0 %v5739_v52  ;;  %v5805_v50 = vld [vmem:[%s7894_s8 + $0x50] ss:$28 sps:$4 sm:$0xff]   ;;  %v5808_v51 = vld [vmem:[%s7894_s8 + $0x84] ss:$28 sps:$4 sm:$0xff]  }
 0x3e0   :  { %v2552_v61 = vpop.f32.mrb[11].mxu1  ;;  %4062 = vmatprep.subr.bf16.mxu1 %v5744_v53  ;;  %4144 = vmatprep.subr.bf16.mxu0 %v5747_v54  ;;  %v2556_v41 = vmax.f32 %v2548_v36, 0.0  ;;  %v5809_v52 = vld [vmem:[%s7894_s8 + $0x248] ss:$28 sps:$4 sm:$0xff]   ;;  %v5806_v53 = vld [vmem:[%s7894_s8 + $0x80] ss:$28 sps:$4 sm:$0xff]  }
 0x3e1   :  { %v2557_v0 = vmax.f32 %v2550_v57, 0.0  ;;  %v5813_v54 = vld [vmem:[%s7894_s8 + $0xbc] ss:$28 sps:$4 sm:$0xff]   ;;  %v5818_v58 = vld [vmem:[%s7894_s8 + $0xf4] ss:$28 sps:$4 sm:$0xff]  }
 0x3e2   :  { %v7540_v45 = vpack.c.bf16 %v2556_v41, %v2556_v41  ;;  %v5811_v56 = vld [vmem:[%s7894_s8 + $0xb8] ss:$28 sps:$4 sm:$0xff]   ;;  %v5815_v57 = vld [vmem:[%s7894_s8 + $0xc0] ss:$28 sps:$4 sm:$0xff]   ;;  %v5856_v36 = vld [vmem:[%s7894_s8 + $0x2b0] ss:$28 sps:$4 sm:$0xff]  }
 0x3e3   :  { %v7434_v1 = vpack.c.bf16 %v2557_v0, %v2557_v0  ;;  %4063 = vmatpush1.bf16.msra.mxu1 %v5742_v59  ;;  %4145 = vmatpush1.bf16.msra.mxu0 %v5745_v60  ;;  %v5819_v59 = vld [vmem:[%s7894_s8 + $0x2b8] ss:$28 sps:$4 sm:$0xff]   ;;  %v5816_v60 = vld [vmem:[%s7894_s8 + $0xf0] ss:$28 sps:$4 sm:$0xff]   ;;  %v5821_v0 = vld [vmem:[%s7894_s8 + $0x128] ss:$28 sps:$4 sm:$0xff]  }
 0x3e4   :  { %4064 = vmatprep.subr.bf16.mxu1 %v5750_v62  ;;  %4146 = vmatprep.subr.bf16.mxu0 %v5753_v63  ;;  %v5820_v61 = vld [vmem:[%s7894_s8 + $0xf8] ss:$28 sps:$4 sm:$0xff]   ;;  %v5823_v62 = vld [vmem:[%s7894_s8 + $0x12c] ss:$28 sps:$4 sm:$0xff]   ;;  %v5854_v32 = vld [vmem:[%s7894_s8 + $0x600] ss:$28 sps:$4 sm:$0xff]  }
 0x3e5   :  { %4080 = vmatprep.mubr.bf16.mxu1 %v7434_v1  ;;  %4162 = vmatprep.mubr.bf16.mxu0 %v7434_v1  ;;  %v5824_v63 = vld [vmem:[%s7894_s8 + $0x2f0] ss:$28 sps:$4 sm:$0xff]  }
 0x3e6   :  { %v5865_v41 = vld [vmem:[%s7894_s8 + $0x4b0] ss:$28 sps:$4 sm:$0xff]  }
 0x3e7   :  { %4065 = vmatpush1.bf16.msra.mxu1 %v5748_v2  ;;  %4147 = vmatpush1.bf16.msra.mxu0 %v5751_v3  ;;  %v5825_v2 = vld [vmem:[%s7894_s8 + $0x130] ss:$28 sps:$4 sm:$0xff]   ;;  %v5828_v3 = vld [vmem:[%s7894_s8 + $0x164] ss:$28 sps:$4 sm:$0xff]  }
 0x3e8   :  { %4066 = vmatprep.subr.bf16.mxu1 %v5756_v5  ;;  %4148 = vmatprep.subr.bf16.mxu0 %v5759_v6  ;;  %v5829_v5 = vld [vmem:[%s7894_s8 + $0x328] ss:$28 sps:$4 sm:$0xff]   ;;  %v5826_v6 = vld [vmem:[%s7894_s8 + $0x160] ss:$28 sps:$4 sm:$0xff]  }
 0x3eb   :  { %4067 = vmatpush1.bf16.msra.mxu1 %v5754_v7  ;;  %4149 = vmatpush1.bf16.msra.mxu0 %v5757_v8  ;;  %v5830_v7 = vld [vmem:[%s7894_s8 + $0x168] ss:$28 sps:$4 sm:$0xff]   ;;  %v5833_v8 = vld [vmem:[%s7894_s8 + $0x19c] ss:$28 sps:$4 sm:$0xff]  }
 0x3ec   :  { %4068 = vmatprep.subr.bf16.mxu1 %v5762_v10  ;;  %4150 = vmatprep.subr.bf16.mxu0 %v5765_v12  ;;  %v5834_v10 = vld [vmem:[%s7894_s8 + $0x360] ss:$28 sps:$4 sm:$0xff]   ;;  %v5831_v12 = vld [vmem:[%s7894_s8 + $0x198] ss:$28 sps:$4 sm:$0xff]  }
 0x3ef   :  { %4069 = vmatpush1.bf16.msra.mxu1 %v5760_v13  ;;  %4151 = vmatpush1.bf16.msra.mxu0 %v5763_v14  ;;  %v5835_v13 = vld [vmem:[%s7894_s8 + $0x1a0] ss:$28 sps:$4 sm:$0xff]   ;;  %v5838_v14 = vld [vmem:[%s7894_s8 + $0x1d4] ss:$28 sps:$4 sm:$0xff]  }
 0x3f0   :  { %4070 = vmatprep.subr.bf16.mxu1 %v5768_v15  ;;  %4152 = vmatprep.subr.bf16.mxu0 %v5771_v16  ;;  %v5839_v15 = vld [vmem:[%s7894_s8 + $0x558] ss:$28 sps:$4 sm:$0xff]   ;;  %v5836_v16 = vld [vmem:[%s7894_s8 + $0x1d0] ss:$28 sps:$4 sm:$0xff]  }
 0x3f3   :  { %4071 = vmatpush1.bf16.msra.mxu1 %v5766_v11  ;;  %4153 = vmatpush1.bf16.msra.mxu0 %v5769_v19  ;;  %v5840_v11 = vld [vmem:[%s7894_s8 + $0x398] ss:$28 sps:$4 sm:$0xff]   ;;  %v5843_v19 = vld [vmem:[%s7894_s8 + $0x20c] ss:$28 sps:$4 sm:$0xff]  }
 0x3f4   :  { %4072 = vmatprep.subr.bf16.mxu1 %v5774_v23  ;;  %4154 = vmatprep.subr.bf16.mxu0 %v5777_v24  ;;  %v5844_v23 = vld [vmem:[%s7894_s8 + $0x590] ss:$28 sps:$4 sm:$0xff]   ;;  %v5841_v24 = vld [vmem:[%s7894_s8 + $0x208] ss:$28 sps:$4 sm:$0xff]  }
 0x3f7   :  { %4073 = vmatpush1.bf16.msra.mxu1 %v5772_v21  ;;  %4155 = vmatpush1.bf16.msra.mxu0 %v5775_v26  ;;  %v5845_v21 = vld [vmem:[%s7894_s8 + $0x3d0] ss:$28 sps:$4 sm:$0xff]   ;;  %v5848_v26 = vld [vmem:[%s7894_s8 + $0x244] ss:$28 sps:$4 sm:$0xff]  }
 0x3f8   :  { %4074 = vmatprep.subr.bf16.mxu1 %v5780_v28  ;;  %4156 = vmatprep.subr.bf16.mxu0 %v5783_v29  ;;  %v5849_v28 = vld [vmem:[%s7894_s8 + $0x5c8] ss:$28 sps:$4 sm:$0xff]   ;;  %v5846_v29 = vld [vmem:[%s7894_s8 + $0x240] ss:$28 sps:$4 sm:$0xff]  }
 0x3fb   :  { %4075 = vmatpush1.bf16.msra.mxu1 %v5778_v30  ;;  %4157 = vmatpush1.bf16.msra.mxu0 %v5781_v31  ;;  %v5850_v30 = vld [vmem:[%s7894_s8 + $0x408] ss:$28 sps:$4 sm:$0xff]   ;;  %v5853_v31 = vld [vmem:[%s7894_s8 + $0x27c] ss:$28 sps:$4 sm:$0xff]  }
 0x3fc   :  { %4076 = vmatprep.subr.bf16.mxu1 %v5786_v33  ;;  %4158 = vmatprep.subr.bf16.mxu0 %v5789_v34  ;;  %v5851_v33 = vld [vmem:[%s7894_s8 + $0x278] ss:$28 sps:$4 sm:$0xff]   ;;  %v5855_v34 = vld [vmem:[%s7894_s8 + $0x440] ss:$28 sps:$4 sm:$0xff]  }
 0x3ff   :  { %4077 = vmatpush1.bf16.msra.mxu1 %v5784_v35  ;;  %4159 = vmatpush1.bf16.msra.mxu0 %v5787_v9  ;;  %v5858_v35 = vld [vmem:[%s7894_s8 + $0x2b4] ss:$28 sps:$4 sm:$0xff]  }
 0x400   :  { %4078 = vmatprep.subr.bf16.mxu1 %v5792_v37  ;;  %4160 = vmatprep.subr.bf16.mxu0 %v5795_v38  ;;  %v5859_v9 = vld [vmem:[%s7894_s8 + $0x638] ss:$28 sps:$4 sm:$0xff]   ;;  %v5863_v38 = vld [vmem:[%s7894_s8 + $0x2ec] ss:$28 sps:$4 sm:$0xff]  }
 0x401   :  { %v5860_v37 = vld [vmem:[%s7894_s8 + $0x478] ss:$28 sps:$4 sm:$0xff]  }
 0x403   :  { %4079 = vmatpush1.bf16.msra.mxu1 %v5790_v39  ;;  %4161 = vmatpush1.bf16.msra.mxu0 %v5793_v40  ;;  %v5864_v39 = vld [vmem:[%s7894_s8 + $0x670] ss:$28 sps:$4 sm:$0xff]   ;;  %v5861_v40 = vld [vmem:[%s7894_s8 + $0x2e8] ss:$28 sps:$4 sm:$0xff]  }
 0x404   :  { %4171 = vmatprep.subr.bf16.mxu1 %v5798_v42  ;;  %5017 = vmatprep.subr.bf16.mxu0 %v5799_v43  ;;  %v5868_v42 = vld [vmem:[%s7894_s8 + $0x324] ss:$28 sps:$4 sm:$0xff]  }
 0x405   :  { %v5869_v43 = vld [vmem:[%s7894_s8 + $0x6a8] ss:$28 sps:$4 sm:$0xff]  }
 0x406   :  { %4081 = vmatmul.mubr.bf16.vlgmr.msra.gmra.mrb[12].mxu1 %v7540_v45  ;;  %4163 = vmatmul.mubr.bf16.vlgmr.msra.gmra.mrb[8].mxu0 %v7540_v45 }
 0x407   :  { %4172 = vmatpush1.bf16.msra.mxu1 %v5796_v44  ;;  %4203 = vmatprep.mubr.bf16.mxu1 %v7326_v25  ;;  %v5866_v44 = vld [vmem:[%s7894_s8 + $0x320] ss:$28 sps:$4 sm:$0xff]  }
 0x408   :  { %5018 = vmatpush3.bf16.msra.mxu0 %v5800_v46  ;;  %4285 = vmatprep.mubr.bf16.mxu0 %v7326_v25  ;;  %v5810_v25 = vld [vmem:[%s7894_s8 + $0x88] ss:$28 sps:$4 sm:$0xff]  }
 0x409   :  { %4173 = vmatprep.subr.bf16.mxu1 %v5803_v47  ;;  %5019 = vmatprep.subr.bf16.mxu0 %v5804_v48  ;;  %v5870_v46 = vld [vmem:[%s7894_s8 + $0x4e8] ss:$28 sps:$4 sm:$0xff]   ;;  %v5873_v47 = vld [vmem:[%s7894_s8 + $0x35c] ss:$28 sps:$4 sm:$0xff]  }
 0x40a   :  { %v5874_v48 = vld [vmem:[%s7894_s8 + $0x6e0] ss:$28 sps:$4 sm:$0xff]  }
 0x40b   :  { %4174 = vmatpush1.bf16.msra.mxu1 %v5801_v49  ;;  %v5871_v49 = vld [vmem:[%s7894_s8 + $0x358] ss:$28 sps:$4 sm:$0xff]  }
 0x40c   :  { %5020 = vmatpush3.bf16.msra.mxu0 %v5805_v50  ;;  %4175 = vmatprep.subr.bf16.mxu1 %v5808_v51  ;;  %v5875_v50 = vld [vmem:[%s7894_s8 + $0x520] ss:$28 sps:$4 sm:$0xff]   ;;  %v5878_v51 = vld [vmem:[%s7894_s8 + $0x394] ss:$28 sps:$4 sm:$0xff]  }
 0x40d   :  { %5021 = vmatprep.subr.bf16.mxu0 %v5809_v52  ;;  %v5876_v52 = vld [vmem:[%s7894_s8 + $0x390] ss:$28 sps:$4 sm:$0xff]  }
 0x40f   :  { %4176 = vmatpush1.bf16.msra.mxu1 %v5806_v53  ;;  %v5881_v53 = vld [vmem:[%s7894_s8 + $0x3cc] ss:$28 sps:$4 sm:$0xff]  }
 0x410   :  { %5022 = vmatpush3.bf16.msra.mxu0 %v5810_v25  ;;  %4177 = vmatprep.subr.bf16.mxu1 %v5813_v54  ;;  %v5879_v25 = vld [vmem:[%s7894_s8 + $0x3c8] ss:$28 sps:$4 sm:$0xff]  }
 0x411   :  { %5023 = vmatprep.subr.bf16.mxu0 %v5814_v55  ;;  %v5884_v54 = vld [vmem:[%s7894_s8 + $0x404] ss:$28 sps:$4 sm:$0xff]  }
 0x412   :  { %v5882_v55 = vld [vmem:[%s7894_s8 + $0x400] ss:$28 sps:$4 sm:$0xff]  }
 0x413   :  { %4178 = vmatpush1.bf16.msra.mxu1 %v5811_v56  ;;  %v5890_v56 = vld [vmem:[%s7894_s8 + $0x474] ss:$28 sps:$4 sm:$0xff]  }
 0x414   :  { %5024 = vmatpush3.bf16.msra.mxu0 %v5815_v57  ;;  %4179 = vmatprep.subr.bf16.mxu1 %v5818_v58  ;;  %v5888_v57 = vld [vmem:[%s7894_s8 + $0x470] ss:$28 sps:$4 sm:$0xff]  }
 0x415   :  { %5025 = vmatprep.subr.bf16.mxu0 %v5819_v59  ;;  %v5893_v58 = vld [vmem:[%s7894_s8 + $0x4ac] ss:$28 sps:$4 sm:$0xff]  }
 0x416   :  { %v5891_v59 = vld [vmem:[%s7894_s8 + $0x4a8] ss:$28 sps:$4 sm:$0xff]  }
 0x417   :  { %4180 = vmatpush1.bf16.msra.mxu1 %v5816_v60  ;;  %v5896_v60 = vld [vmem:[%s7894_s8 + $0x4e4] ss:$28 sps:$4 sm:$0xff]  }
 0x418   :  { %5026 = vmatpush3.bf16.msra.mxu0 %v5820_v61  ;;  %4181 = vmatprep.subr.bf16.mxu1 %v5823_v62  ;;  %v5894_v61 = vld [vmem:[%s7894_s8 + $0x4e0] ss:$28 sps:$4 sm:$0xff]  }
 0x419   :  { %5027 = vmatprep.subr.bf16.mxu0 %v5824_v63  ;;  %v5899_v62 = vld [vmem:[%s7894_s8 + $0x51c] ss:$28 sps:$4 sm:$0xff]  }
 0x41a   :  { %v5897_v63 = vld [vmem:[%s7894_s8 + $0x518] ss:$28 sps:$4 sm:$0xff]  }
 0x41b   :  { %4182 = vmatpush1.bf16.msra.mxu1 %v5821_v0  ;;  %v5902_v0 = vld [vmem:[%s7894_s8 + $0x554] ss:$28 sps:$4 sm:$0xff]  }
 0x41c   :  { %5028 = vmatpush3.bf16.msra.mxu0 %v5825_v2  ;;  %4183 = vmatprep.subr.bf16.mxu1 %v5828_v3  ;;  %v5900_v2 = vld [vmem:[%s7894_s8 + $0x550] ss:$28 sps:$4 sm:$0xff]  }
 0x41d   :  { %5029 = vmatprep.subr.bf16.mxu0 %v5829_v5  ;;  %v5905_v3 = vld [vmem:[%s7894_s8 + $0x58c] ss:$28 sps:$4 sm:$0xff]  }
 0x41e   :  { %v5903_v5 = vld [vmem:[%s7894_s8 + $0x588] ss:$28 sps:$4 sm:$0xff]  }
 0x41f   :  { %4184 = vmatpush1.bf16.msra.mxu1 %v5826_v6  ;;  %v5908_v6 = vld [vmem:[%s7894_s8 + $0x5c4] ss:$28 sps:$4 sm:$0xff]  }
 0x420   :  { %5030 = vmatpush3.bf16.msra.mxu0 %v5830_v7  ;;  %4185 = vmatprep.subr.bf16.mxu1 %v5833_v8  ;;  %v5906_v7 = vld [vmem:[%s7894_s8 + $0x5c0] ss:$28 sps:$4 sm:$0xff]  }
 0x421   :  { %5031 = vmatprep.subr.bf16.mxu0 %v5834_v10  ;;  %v5911_v8 = vld [vmem:[%s7894_s8 + $0x5fc] ss:$28 sps:$4 sm:$0xff]  }
 0x422   :  { %v5909_v10 = vld [vmem:[%s7894_s8 + $0x5f8] ss:$28 sps:$4 sm:$0xff]  }
 0x423   :  { %4186 = vmatpush1.bf16.msra.mxu1 %v5831_v12  ;;  %v5914_v12 = vld [vmem:[%s7894_s8 + $0x634] ss:$28 sps:$4 sm:$0xff]  }
 0x424   :  { %5032 = vmatpush3.bf16.msra.mxu0 %v5835_v13  ;;  %4187 = vmatprep.subr.bf16.mxu1 %v5838_v14  ;;  %v5912_v13 = vld [vmem:[%s7894_s8 + $0x630] ss:$28 sps:$4 sm:$0xff]  }
 0x425   :  { %5039 = vmatprep.subr.bf16.mxu0 %v5839_v15  ;;  %v5917_v14 = vld [vmem:[%s7894_s8 + $0x66c] ss:$28 sps:$4 sm:$0xff]  }
 0x426   :  { %v5915_v15 = vld [vmem:[%s7894_s8 + $0x668] ss:$28 sps:$4 sm:$0xff]  }
 0x427   :  { %4286 = vmatmul.mubr.bf16.vlgmr.msra.gmra.mrb[12].mxu0 %v7334_v27  ;;  %4188 = vmatpush1.bf16.msra.mxu1 %v5836_v16  ;;  %v5920_v16 = vld [vmem:[%s7894_s8 + $0x6a4] ss:$28 sps:$4 sm:$0xff]  }
 0x428   :  { %5040 = vmatpush3.bf16.msra.mxu0 %v5840_v11  ;;  %4325 = vmatprep.mubr.bf16.mxu0 %v7434_v1  ;;  %v5918_v11 = vld [vmem:[%s7894_s8 + $0x6a0] ss:$28 sps:$4 sm:$0xff]  }
 0x429   :  { %4189 = vmatprep.subr.bf16.mxu1 %v5843_v19  ;;  %5041 = vmatprep.subr.bf16.mxu0 %v5844_v23  ;;  %v5923_v19 = vld [vmem:[%s7894_s8 + $0x6dc] ss:$28 sps:$4 sm:$0xff]  }
 0x42a   :  { %v5921_v23 = vld [vmem:[%s7894_s8 + $0x6d8] ss:$28 sps:$4 sm:$0xff]  }
 0x42b   :  { %4190 = vmatpush1.bf16.msra.mxu1 %v5841_v24  ;;  %v7834_v24 = vld [vmem:[%s7895_s9] sm:$0xff] }
 0x42c   :  { %5042 = vmatpush3.bf16.msra.mxu0 %v5845_v21  ;;  %4191 = vmatprep.subr.bf16.mxu1 %v5848_v26  ;;  %v2823_v21 = vrot.slane %v7834_v24, %v6906_v18  ;;  %v2831_v26 = vrot.slane %v7834_v24, %v7003_v4 }
 0x42d   :  { %5043 = vmatprep.subr.bf16.mxu0 %v5849_v28  ;;  %v2827_v28 = vrot.slane %v7834_v24, %v6914_v20 }
 0x42f   :  { %4192 = vmatpush1.bf16.msra.mxu1 %v5846_v29  ;;  %v2835_v29 = vrot.slane %v7834_v24, %v6917_v22 }
 0x430   :  { %5044 = vmatpush3.bf16.msra.mxu0 %v5850_v30  ;;  %4193 = vmatprep.subr.bf16.mxu1 %v5853_v31 }
 0x431   :  { %5045 = vmatprep.subr.bf16.mxu0 %v5854_v32 }
 0x433   :  { %4194 = vmatpush1.bf16.msra.mxu1 %v5851_v33 }
 0x434   :  { %5046 = vmatpush3.bf16.msra.mxu0 %v5855_v34  ;;  %4195 = vmatprep.subr.bf16.mxu1 %v5858_v35 }
 0x435   :  { %5047 = vmatprep.subr.bf16.mxu0 %v5859_v9 }
 0x437   :  { %4196 = vmatpush1.bf16.msra.mxu1 %v5856_v36 }
 0x438   :  { %5048 = vmatpush3.bf16.msra.mxu0 %v5860_v37  ;;  %4197 = vmatprep.subr.bf16.mxu1 %v5863_v38 }
 0x439   :  { %5049 = vmatprep.subr.bf16.mxu0 %v5864_v39 }
 0x43b   :  { %4198 = vmatpush1.bf16.msra.mxu1 %v5861_v40 }
 0x43c   :  { %5050 = vmatpush3.bf16.msra.mxu0 %v5865_v41  ;;  %4199 = vmatprep.subr.bf16.mxu1 %v5868_v42 }
 0x43d   :  { %5051 = vmatprep.subr.bf16.mxu0 %v5869_v43 }
 0x43f   :  { %4200 = vmatpush1.bf16.msra.mxu1 %v5866_v44 }
 0x440   :  { %5052 = vmatpush3.bf16.msra.mxu0 %v5870_v46  ;;  %4201 = vmatprep.subr.bf16.mxu1 %v5873_v47 }
 0x441   :  { %5053 = vmatprep.subr.bf16.mxu0 %v5874_v48 }
 0x443   :  { %4202 = vmatpush1.bf16.msra.mxu1 %v5871_v49 }
 0x444   :  { %5054 = vmatpush3.bf16.msra.mxu0 %v5875_v50  ;;  %4212 = vmatprep.subr.bf16.mxu1 %v5878_v51 }
 0x446   :  { %4204 = vmatmul.mubr.bf16.vlgmr.msra.gmra.mrb[16].mxu1 %v7334_v27  ;;  %v5887_v27 = vld [vmem:[%s7894_s8 + $0x43c] ss:$28 sps:$4 sm:$0xff]  }
 0x447   :  { %4326 = vmatmul.mubr.bf16.vlgmr.msra.gmra.mrb[16].mxu0 %v7540_v45  ;;  %4213 = vmatpush1.bf16.msra.mxu1 %v5876_v52 }
 0x448   :  { %4244 = vmatprep.mubr.bf16.mxu1 %v7434_v1  ;;  %4214 = vmatprep.subr.bf16.mxu1 %v5881_v53  ;;  %v5885_v1 = vld [vmem:[%s7894_s8 + $0x438] ss:$28 sps:$4 sm:$0xff]   ;;  %s6025_s8 = smov [#allocation4]  }
 0x449   :  { %s4426_s9 = sshll.u32 %s6025_s8, 4  ;;  %s4427_s9 = int_to_ptr.vmem [resolvable:$true] %s4426_s9 }
 0x44a   :  { %s5954_s6 = scalar_lea.vmem %s4427_s9, 128  ;;  %p5959_p1 = scmp.lt.s32.totalorder %s4427_s9, %s4427_s9 }
 0x44b   :  { %4215 = vmatpush1.bf16.msra.mxu1 %v5879_v25  ;;  %p5955_p0 = scmp.ne.s32.totalorder %s4427_s9, %s5954_s6  ;;  %p5960_p2 = scmp.lt.s32.totalorder %s5954_s6, %s5954_s6 }
 0x44c   :  { %4216 = vmatprep.subr.bf16.mxu1 %v5884_v54 }
 0x44d   :  { %p5961_p3 = por %p5960_p2, %p5959_p1 }
 0x44f   :  { %4217 = vmatpush1.bf16.msra.mxu1 %v5882_v55  ;;  %p5962_p4 = pnand %p5961_p3, %p5955_p0 }
 0x450   :  { %4218 = vmatprep.subr.bf16.mxu1 %v5887_v27 }
 0x453   :  { %4219 = vmatpush1.bf16.msra.mxu1 %v5885_v1 }
 0x454   :  { %4220 = vmatprep.subr.bf16.mxu1 %v5890_v56 }
 0x457   :  { %4221 = vmatpush1.bf16.msra.mxu1 %v5888_v57 }
 0x458   :  { %4222 = vmatprep.subr.bf16.mxu1 %v5893_v58 }
 0x45b   :  { %4223 = vmatpush1.bf16.msra.mxu1 %v5891_v59 }
 0x45c   :  { %4224 = vmatprep.subr.bf16.mxu1 %v5896_v60 }
 0x45f   :  { %4225 = vmatpush1.bf16.msra.mxu1 %v5894_v61 }
 0x460   :  { %4226 = vmatprep.subr.bf16.mxu1 %v5899_v62 }
 0x463   :  { %4227 = vmatpush1.bf16.msra.mxu1 %v5897_v63 }
 0x464   :  { %4228 = vmatprep.subr.bf16.mxu1 %v5902_v0 }
 0x467   :  { %4229 = vmatpush1.bf16.msra.mxu1 %v5900_v2 }
 0x468   :  { %4230 = vmatprep.subr.bf16.mxu1 %v5905_v3 }
 0x46b   :  { %4231 = vmatpush1.bf16.msra.mxu1 %v5903_v5 }
 0x46c   :  { %4232 = vmatprep.subr.bf16.mxu1 %v5908_v6 }
 0x46f   :  { %4233 = vmatpush1.bf16.msra.mxu1 %v5906_v7 }
 0x470   :  { %4234 = vmatprep.subr.bf16.mxu1 %v5911_v8 }
 0x473   :  { %4235 = vmatpush1.bf16.msra.mxu1 %v5909_v10 }
 0x474   :  { %4236 = vmatprep.subr.bf16.mxu1 %v5914_v12 }
 0x477   :  { %4237 = vmatpush1.bf16.msra.mxu1 %v5912_v13 }
 0x478   :  { %4238 = vmatprep.subr.bf16.mxu1 %v5917_v14 }
 0x47b   :  { %4239 = vmatpush1.bf16.msra.mxu1 %v5915_v15 }
 0x47c   :  { %4240 = vmatprep.subr.bf16.mxu1 %v5920_v16 }
 0x47f   :  { %4241 = vmatpush1.bf16.msra.mxu1 %v5918_v11 }
 0x480   :  { %4242 = vmatprep.subr.bf16.mxu1 %v5923_v19 }
 0x483   :  { %4243 = vmatpush1.bf16.msra.mxu1 %v5921_v23 }
 0x486   :  { %4245 = vmatmul.mubr.bf16.vlgmr.msra.gmra.mrb[16].mxu1 %v7540_v45 }
 0x4d9   :  { %v4082_v30 = vpop.f32.mrb[12].mxu1  ;;  %v4164_v31 = vpop.f32.mrb[8].mxu0 }
 0x4da   :  { %v5067_v45 = vadd.f32 %v4082_v30, %v2823_v21  ;;  %v5069_v32 = vadd.f32 %v4164_v31, %v2831_v26  ;;  %v4084_v33 = vpop.f32.mrb[13].mxu1  ;;  %v4166_v34 = vpop.f32.mrb[9].mxu0 }
 0x4db   :  { %v5068_v35 = vadd.f32 %v4084_v33, %v2827_v28  ;;  %v5070_v9 = vadd.f32 %v4166_v34, %v2835_v29  ;;  %v4086_v36 = vpop.f32.mrb[14].mxu1  ;;  %v4168_v37 = vpop.f32.mrb[10].mxu0 }
 0x4dc   :  { %v5002_v18 = vmul.f32 -1.442695, %v5067_v45  ;;  %v5004_v38 = vmul.f32 -1.442695, %v5069_v32  ;;  %v4087_v39 = vpop.f32.mrb[15].mxu1  ;;  %v4169_v4 = vpop.f32.mrb[11].mxu0 }
 0x4dd   :  { %v5003_v40 = vmul.f32 -1.442695, %v5068_v35  ;;  %v5005_v41 = vmul.f32 -1.442695, %v5070_v9 }
 0x4de   :  { %5926 = vpow2.f32 %v5002_v18 }
 0x4df   :  { %5928 = vpow2.f32 %v5004_v38 }
 0x4e0   :  { %5930 = vpow2.f32 %v5003_v40 }
 0x4e1   :  { %5932 = vpow2.f32 %v5005_v41 }
 0x4e8   :  { %v5927_v20 = vpop.eup %5926 }
 0x4e9   :  { %v5929_v22 = vpop.eup %5928  ;;  %v4354_v42 = vadd.f32 1.0, %v5927_v20 }
 0x4ea   :  { %v5931_v43 = vpop.eup %5930  ;;  %v4356_v44 = vadd.f32 1.0, %v5929_v22 }
 0x4eb   :  { %v5933_v46 = vpop.eup %5932  ;;  %5934 = vrcp.f32 %v4354_v42  ;;  %v4355_v47 = vadd.f32 1.0, %v5931_v43 }
 0x4ec   :  { %5936 = vrcp.f32 %v4356_v44  ;;  %v4357_v48 = vadd.f32 1.0, %v5933_v46 }
 0x4ed   :  { %5938 = vrcp.f32 %v4355_v47 }
 0x4ee   :  { %5940 = vrcp.f32 %v4357_v48 }
 0x4ef   :  { %5965 = shalt.err (!%p5962_p4)
}
 0x4f0   :  { %s5966_s14 = scalar_lea.hbm %s7897_s11, 128 }
 0x4f1   :  { %p5967_p5 = scmp.ne.s32.totalorder %s7897_s11, %s5966_s14  ;;  %p5970_p6 = scmp.lt.u32.totalorder %s5966_s14, %s7897_s11 }
 0x4f3   :  { %p5972_p7 = pnand %p5970_p6, %p5967_p5 }
 0x4f5   :  { %5975 = shalt.err (!%p5972_p7)
}
 0x4f6   :  { %4429 = dma.vmem_to_hbm [thread:$0]  %s4427_s9, 128, %s7897_s11, [#allocation5]   ;;  %v5935_v49 = vpop.eup %5934 }
 0x4f7   :  { %v5937_v50 = vpop.eup %5936  ;;  %s6026_s19 = smov [#allocation6]  }
 0x4f8   :  { %v5939_v51 = vpop.eup %5938  ;;  %s4436_s5 = sshll.u32 %s6026_s19, 4  ;;  %s4437_s5 = int_to_ptr.vmem [resolvable:$true] %s4436_s5 }
 0x4f9   :  { %v5941_v52 = vpop.eup %5940  ;;  %v5013_v53 = vpack.c.bf16 %v5939_v51, %v5935_v49  ;;  %s5976_s20 = scalar_lea.vmem %s4437_s5, 128  ;;  %p5981_p9 = scmp.lt.s32.totalorder %s4437_s5, %s4437_s5 }
 0x4fa   :  { %v5014_v25 = vpack.c.bf16 %v5941_v52, %v5937_v50  ;;  %v5033_v54 = vpop.f32.mrb[12].mxu0  ;;  %p5977_p8 = scmp.ne.s32.totalorder %s4437_s5, %s5976_s20  ;;  %p5982_p10 = scmp.lt.s32.totalorder %s5976_s20, %s5976_s20 }
 0x4fb   :  { %4404 = vst [vmem:[#allocation2] sm:$0xff] %v5013_v53  ;;  %v5034_v55 = vpop.f32.mrb[13].mxu0 }
 0x4fc   :  { %4405 = vst [vmem:[#allocation2 + $0x8] sm:$0xff] %v5014_v25  ;;  %v5035_v27 = vadd.f32 %v5034_v55, %v5033_v54  ;;  %v5036_v1 = vpop.f32.mrb[14].mxu0  ;;  %p5983_p11 = por %p5982_p10, %p5981_p9 }
 0x4fe   :  { %p5984_p12 = pnand %p5983_p11, %p5977_p8 }
 0x500   :  { %5987 = shalt.err (!%p5984_p12)
}
 0x501   :  { %s5988_s22 = scalar_lea.hbm %s7898_s12, 128 }
 0x502   :  { %p5989_p13 = scmp.ne.s32.totalorder %s7898_s12, %s5988_s22  ;;  %p5992_p0 = scmp.lt.u32.totalorder %s5988_s22, %s7898_s12 }
 0x504   :  { %p5994_p1 = pnand %p5992_p0, %p5989_p13 }
 0x506   :  { %5997 = shalt.err (!%p5994_p1)
}
 0x507   :  { %4439 = dma.vmem_to_hbm [thread:$0]  %s4437_s5, 128, %s7898_s12, [#allocation5]   ;;  %v5037_v56 = vpop.f32.mrb[15].mxu0  ;;  %v2846_v57 = vsub.s32 6, %v6903_v17  ;;  %v2838_v10 = vsub.s32 4, %v6903_v17  ;;  %v2842_v12 = vsub.s32 5, %v6903_v17 }
 0x508   :  { %s6027_s12 = smov [#allocation2]  }
 0x509   :  { %v2847_v58 = vrot.slane %v7834_v24, %v2846_v57  ;;  %v2839_v13 = vrot.slane %v7834_v24, %v2838_v10  ;;  %v2843_v14 = vrot.slane %v7834_v24, %v2842_v12  ;;  %s4416_s4 = sshll.u32 %s6027_s12, 4  ;;  %s4417_s4 = int_to_ptr.vmem [resolvable:$true] %s4416_s4 }
 0x50a   :  { %s5998_s7 = scalar_lea.vmem %s4417_s4, 448  ;;  %p6003_p3 = scmp.lt.s32.totalorder %s4417_s4, %s4417_s4 }
 0x50b   :  { %v4288_v61 = vadd.f32 %v5035_v27, %v2847_v58  ;;  %p5999_p2 = scmp.ne.s32.totalorder %s4417_s4, %s5998_s7  ;;  %p6004_p4 = scmp.lt.s32.totalorder %s5998_s7, %s5998_s7 }
 0x50d   :  { %p6005_p5 = por %p6004_p4, %p6003_p3 }
 0x50f   :  { %p6006_p6 = pnand %p6005_p5, %p5999_p2 }
 0x51a   :  { %v5055_v59 = vpop.f32.mrb[16].mxu0 }
 0x51b   :  { %v5056_v60 = vpop.f32.mrb[17].mxu0 }
 0x51c   :  { %v5057_v62 = vadd.f32 %v5056_v60, %v5055_v59  ;;  %v5058_v63 = vpop.f32.mrb[18].mxu0 }
 0x51d   :  { %v5059_v0 = vpop.f32.mrb[19].mxu0 }
 0x51e   :  { %v4328_v2 = vadd.f32 %v5057_v62, %v4288_v61 }
 0x520   :  { %v5008_v3 = vmul.f32 -1.442695, %v4328_v2 }
 0x522   :  { %5942 = vpow2.f32 %v5008_v3 }
 0x52c   :  { %v5943_v5 = vpop.eup %5942 }
 0x52d   :  { %v4360_v6 = vadd.f32 1.0, %v5943_v5 }
 0x52f   :  { %5944 = vrcp.f32 %v4360_v6 }
 0x539   :  { %v5945_v7 = vpop.eup %5944 }
 0x53a   :  { %v5016_v8 = vpack.c.bf16 %v5945_v7, %v5945_v7 }
 0x53c   :  { %4407 = vst [vmem:[#allocation2 + $0x18] sm:$0xf] %v5016_v8 }
 0x559   :  { %v4246_v15 = vpop.f32.mrb[16].mxu1 }
 0x55a   :  { %v5071_v16 = vadd.f32 %v4246_v15, %v2839_v13  ;;  %v4248_v11 = vpop.f32.mrb[17].mxu1 }
 0x55b   :  { %v5072_v19 = vadd.f32 %v4248_v11, %v2843_v14  ;;  %v4250_v23 = vpop.f32.mrb[18].mxu1 }
 0x55c   :  { %v5006_v21 = vmul.f32 -1.442695, %v5071_v16  ;;  %v4251_v26 = vpop.f32.mrb[19].mxu1 }
 0x55d   :  { %v5007_v28 = vmul.f32 -1.442695, %v5072_v19 }
 0x55e   :  { %5946 = vpow2.f32 %v5006_v21 }
 0x55f   :  { %5948 = vpow2.f32 %v5007_v28 }
 0x568   :  { %v5947_v29 = vpop.eup %5946 }
 0x569   :  { %v5949_v30 = vpop.eup %5948  ;;  %v4358_v31 = vadd.f32 1.0, %v5947_v29 }
 0x56a   :  { %v4359_v45 = vadd.f32 1.0, %v5949_v30 }
 0x56b   :  { %5950 = vrcp.f32 %v4358_v31 }
 0x56c   :  { %5952 = vrcp.f32 %v4359_v45 }
 0x575   :  { %v5951_v17 = vpop.eup %5950 }
 0x576   :  { %v5953_v24 = vpop.eup %5952 }
 0x577   :  { %v5015_v32 = vpack.c.bf16 %v5953_v24, %v5951_v17 }
 0x579   :  { %4406 = vst [vmem:[#allocation2 + $0x10] sm:$0xff] %v5015_v32 }
 0x57a   :  { %6009 = shalt.err (!%p6006_p6)
}
 0x57b   :  { %s6010_s29 = scalar_lea.hbm %s7896_s10, 448 }
 0x57c   :  { %p6011_p7 = scmp.ne.s32.totalorder %s7896_s10, %s6010_s29  ;;  %p6014_p8 = scmp.lt.u32.totalorder %s6010_s29, %s7896_s10 }
 0x57e   :  { %p6016_p9 = pnand %p6014_p8, %p6011_p7 }
 0x580   :  { %6019 = shalt.err (!%p6016_p9)
}
 0x581   :  { %4419 = dma.vmem_to_hbm [thread:$0]  %s4417_s4, 448, %s7896_s10, [#allocation3]  }
 0x582   :  { %6020 = dma.done.wait [#allocation3], 448  }
 0x583   :  { %6021 = vsyncadd [#allocation3], 4294966848 }
 0x584   :  { %6022 = dma.done.wait [#allocation5], 256  }
 0x585   :  { %6023 = vsyncadd [#allocation5], 4294967040 }
 0x586   :  { %4449 = vsyncpa [#allocation3], 1 }
 0x587   :  { %4450 = vsyncpa [#allocation5], 1 }

</bundles_post_ra>
